<compile_context>
chip_gen: v7x
topology: tpu7x:2x2x1
jax: 0.10.0
libtpu: 0.0.40
codegen_flags: <defaults>
</compile_context>

<pallas_src>
import functools

import jax
import jax.numpy as jnp
from jax.experimental import pallas as pl
from jax.experimental.pallas import tpu as pltpu


def _choose_block_batch(B, C, HW, itemsize, vmem_budget_bytes):
    """Pick the per-grid-step batch block.

    VMEM per step ~= 4 * bb * C * HW * itemsize (input + output tiles, each
    double buffered).  Cap bb by the budget, aim for >= 8 grid steps so the
    prologue/epilogue DMAs are hidden, but keep each tile >= ~0.5 MiB so the
    ~0.35us per-step overhead stays amortized.
    """
    bytes_per_batch = C * HW * itemsize
    bb_vmem = max(1, vmem_budget_bytes // (4 * bytes_per_batch))
    bb_tile_floor = max(1, pl.cdiv(512 * 1024, bytes_per_batch))
    bb_target = max(bb_tile_floor, pl.cdiv(B, 8))
    return max(1, min(bb_vmem, bb_target, B))


def _eca_kernel(w_ref, x_ref, o_ref, *, k, pad, C):
    # w_ref: (k,) f32 conv taps in SMEM, with 1/HW already folded in.
    # x_ref: (bb, C, HW) input tile in VMEM (native dtype).
    # o_ref: (bb, C, HW) output tile in VMEM.

    # Squeeze: raw spatial sum in f32 (the mean's 1/HW lives in the taps).
    pooled = jnp.sum(x_ref[...], axis=-1, dtype=jnp.float32)          # (bb, C)

    # Excitation: k-tap 1D cross-correlation over channels with zero padding.
    # Channels sit on the lane dim -> neighbour access via XLU lane rolls.
    ch = jax.lax.broadcasted_iota(jnp.int32, pooled.shape, 1)
    y = w_ref[pad] * pooled                                            # centre tap (d == 0)
    for t in range(k):
        d = t - pad
        if d == 0:
            continue
        shifted = pltpu.roll(pooled, shift=(-d) % C, axis=1)           # shifted[c] = p[(c+d) mod C]
        valid = (ch + d >= 0) & (ch + d < C)                           # zero padding at the edges
        y = y + w_ref[t] * jnp.where(valid, shifted, 0.0)

    gate = jax.nn.sigmoid(y).astype(o_ref.dtype)                       # (bb, C)

    # Scale: second streamed read of x, native-dtype multiply, per-channel gate
    # broadcast over the spatial lanes.
    o_ref[...] = x_ref[...] * gate[:, :, None]


def eca_forward(x_nchw, conv_w, *, vmem_budget_bytes=32 * 1024 * 1024):
    """ECA forward.

    x_nchw : (B, C, H, W)
    conv_w : (k,)  -- PyTorch Conv1d(1, 1, k, padding=(k-1)//2, bias=False)
                      weight, i.e. conv.weight[0, 0].
    """
    B, C, H, W = x_nchw.shape
    k = int(conv_w.shape[0])
    pad = (k - 1) // 2
    HW = H * W

    x3 = x_nchw.reshape(B, C, HW)                 # free reshape (row-major)

    # Fold 1/HW of the average pool into the conv taps.
    w = conv_w.astype(jnp.float32) * (1.0 / HW)   # (k,) f32, lives in SMEM

    itemsize = jnp.dtype(x3.dtype).itemsize
    bb = _choose_block_batch(B, C, HW, itemsize, vmem_budget_bytes)
    grid = (pl.cdiv(B, bb),)                      # partial tail block is fine:
                                                  # computation is row-independent,
                                                  # OOB writes are dropped.

    per_step_bytes = 4 * bb * C * HW * itemsize
    vmem_limit = min(max(vmem_budget_bytes, per_step_bytes) + 4 * 1024 * 1024,
                     64 * 1024 * 1024)            # safe on v5e/v6e/v7x

    cost = pl.CostEstimate(
        flops=2 * B * C * HW + 2 * B * C * k,
        transcendentals=2 * B * C,                # sigmoid ~ exp + reciprocal
        bytes_accessed=2 * B * C * HW * itemsize + k * 4,
    )

    kernel = functools.partial(_eca_kernel, k=k, pad=pad, C=C)

    out3 = pl.pallas_call(
        kernel,
        out_shape=jax.ShapeDtypeStruct((B, C, HW), x3.dtype),
        grid_spec=pltpu.PrefetchScalarGridSpec(
            num_scalar_prefetch=0,
            grid=grid,
            in_specs=[
                pl.BlockSpec(memory_space=pltpu.MemorySpace.SMEM),   # (k,) taps
                pl.BlockSpec((bb, C, HW), lambda b: (b, 0, 0)),      # x tile
            ],
            out_specs=pl.BlockSpec((bb, C, HW), lambda b: (b, 0, 0)),
        ),
        compiler_params=pltpu.CompilerParams(
            dimension_semantics=("parallel",),
            vmem_limit_bytes=vmem_limit,
        ),
        cost_estimate=cost,
    )(w, x3)

    return out3.reshape(B, C, H, W)


def eca_reference(x_nchw, conv_w):
    """Pure-JAX reference matching the PyTorch ECA module exactly."""
    pooled = jnp.mean(x_nchw, axis=(2, 3))                    # (B, C)
    k = conv_w.shape[0]
    pad = (k - 1) // 2
    C = pooled.shape[1]
    pp = jnp.pad(pooled, ((0, 0), (pad, pad)))
    y = sum(conv_w[i] * pp[:, i:i + C] for i in range(k))     # cross-correlation
    gate = jax.nn.sigmoid(y)
    return x_nchw * gate[:, :, None, None]


if __name__ == "__main__":
    key = jax.random.PRNGKey(0)

    # Case 1: k=3, 16x16 spatial (HW = 256, lane-dense), single grid step.
    kx, kw, key = jax.random.split(key, 3)
    B, C, H, W = 2, 128, 16, 16
    x = jax.random.normal(kx, (B, C, H, W), dtype=jnp.float32)
    conv_w = jax.random.normal(kw, (3,), dtype=jnp.float32) * 0.5
    out = jax.block_until_ready(eca_forward(x, conv_w))
    ref = eca_reference(x, conv_w)
    assert out.shape == (B, C, H, W)
    assert jnp.allclose(out, ref, atol=1e-5, rtol=1e-5), "mismatch vs reference (case 1)"

    # Case 2: k=5 (pad=2 rolls), HW = 14*14 = 196 (masked tail lanes), and a
    # small VMEM budget to force bb=1 -> a 4-step pipelined grid.
    kx2, kw2, key = jax.random.split(key, 3)
    B2, C2, H2, W2 = 4, 128, 14, 14
    x2 = jax.random.normal(kx2, (B2, C2, H2, W2), dtype=jnp.float32)
    conv_w2 = jax.random.normal(kw2, (5,), dtype=jnp.float32) * 0.5
    out2 = jax.block_until_ready(
        eca_forward(x2, conv_w2, vmem_budget_bytes=512 * 1024))
    ref2 = eca_reference(x2, conv_w2)
    assert out2.shape == (B2, C2, H2, W2)
    assert jnp.allclose(out2, ref2, atol=1e-5, rtol=1e-5), "mismatch vs reference (case 2)"

    print("KERNEL_OK")
</pallas_src>

<mosaic_0001>
module attributes {stable_mosaic.version = 11 : i64} {
  func.func @_eca_kernel(%arg0: i32, %arg1: memref<3xf32, #tpu.memory_space<smem>>, %arg2: memref<2x128x256xf32, #tpu.memory_space<vmem>>, %arg3: memref<2x128x256xf32, #tpu.memory_space<vmem>>) attributes {dimension_semantics = [#tpu.dimension_semantics<parallel>], iteration_bounds = array<i64: 1>, scalar_prefetch = 0 : i64, scratch_operands = 0 : i64, tpu.core_type = #tpu.core_type<tc>, window_params = [{transform_indices = @transform_0, window_bounds = array<i64: 3>}, {transform_indices = @transform_1, window_bounds = array<i64: 2, 128, 256>}, {transform_indices = @transform_2, window_bounds = array<i64: 2, 128, 256>}]} {
    %c0 = arith.constant 0 : index
    %c0_0 = arith.constant 0 : index
    %c0_1 = arith.constant 0 : index
    %0 = vector.load %arg2[%c0, %c0_0, %c0_1] : memref<2x128x256xf32, #tpu.memory_space<vmem>>, vector<2x128x256xf32>
    %cst = arith.constant dense<0.000000e+00> : vector<2x128xf32>
    %1 = vector.multi_reduction <add>, %0, %cst [2] : vector<2x128x256xf32> to vector<2x128xf32>
    %2 = tpu.iota {dimensions = array<i32: 1>} : vector<2x128xi32>
    %c1 = arith.constant 1 : index
    %3 = memref.load %arg1[%c1] : memref<3xf32, #tpu.memory_space<smem>>
    %4 = vector.broadcast %3 : f32 to vector<2x128xf32>
    %5 = arith.mulf %4, %1 : vector<2x128xf32>
    %c1_i32 = arith.constant 1 : i32
    %6 = tpu.dynamic_rotate %1 by %c1_i32 dim 1 : vector<2x128xf32>, i32 -> vector<2x128xf32>
    %c-1_i32 = arith.constant -1 : i32
    %7 = vector.broadcast %c-1_i32 : i32 to vector<2x128xi32>
    %8 = arith.addi %2, %7 : vector<2x128xi32>
    %c0_i32 = arith.constant 0 : i32
    %9 = vector.broadcast %c0_i32 : i32 to vector<2x128xi32>
    %10 = arith.cmpi sge, %8, %9 : vector<2x128xi32>
    %c-1_i32_2 = arith.constant -1 : i32
    %11 = vector.broadcast %c-1_i32_2 : i32 to vector<2x128xi32>
    %12 = arith.addi %2, %11 : vector<2x128xi32>
    %c128_i32 = arith.constant 128 : i32
    %13 = vector.broadcast %c128_i32 : i32 to vector<2x128xi32>
    %14 = arith.cmpi slt, %12, %13 : vector<2x128xi32>
    %15 = arith.andi %10, %14 : vector<2x128xi1>
    %c0_3 = arith.constant 0 : index
    %16 = memref.load %arg1[%c0_3] : memref<3xf32, #tpu.memory_space<smem>>
    %cst_4 = arith.constant 0.000000e+00 : f32
    %17 = vector.broadcast %cst_4 : f32 to vector<2x128xf32>
    %18 = arith.select %15, %6, %17 : vector<2x128xi1>, vector<2x128xf32>
    %19 = vector.broadcast %16 : f32 to vector<2x128xf32>
    %20 = arith.mulf %19, %18 : vector<2x128xf32>
    %21 = arith.addf %5, %20 : vector<2x128xf32>
    %c127_i32 = arith.constant 127 : i32
    %22 = tpu.dynamic_rotate %1 by %c127_i32 dim 1 : vector<2x128xf32>, i32 -> vector<2x128xf32>
    %c1_i32_5 = arith.constant 1 : i32
    %23 = vector.broadcast %c1_i32_5 : i32 to vector<2x128xi32>
    %24 = arith.addi %2, %23 : vector<2x128xi32>
    %c0_i32_6 = arith.constant 0 : i32
    %25 = vector.broadcast %c0_i32_6 : i32 to vector<2x128xi32>
    %26 = arith.cmpi sge, %24, %25 : vector<2x128xi32>
    %c1_i32_7 = arith.constant 1 : i32
    %27 = vector.broadcast %c1_i32_7 : i32 to vector<2x128xi32>
    %28 = arith.addi %2, %27 : vector<2x128xi32>
    %c128_i32_8 = arith.constant 128 : i32
    %29 = vector.broadcast %c128_i32_8 : i32 to vector<2x128xi32>
    %30 = arith.cmpi slt, %28, %29 : vector<2x128xi32>
    %31 = arith.andi %26, %30 : vector<2x128xi1>
    %c2 = arith.constant 2 : index
    %32 = memref.load %arg1[%c2] : memref<3xf32, #tpu.memory_space<smem>>
    %cst_9 = arith.constant 0.000000e+00 : f32
    %33 = vector.broadcast %cst_9 : f32 to vector<2x128xf32>
    %34 = arith.select %31, %22, %33 : vector<2x128xi1>, vector<2x128xf32>
    %35 = vector.broadcast %32 : f32 to vector<2x128xf32>
    %36 = arith.mulf %35, %34 : vector<2x128xf32>
    %37 = arith.addf %21, %36 : vector<2x128xf32>
    %38 = arith.negf %37 : vector<2x128xf32>
    %39 = math.exp %38 : vector<2x128xf32>
    %cst_10 = arith.constant 1.000000e+00 : f32
    %40 = vector.broadcast %cst_10 : f32 to vector<2x128xf32>
    %41 = arith.addf %40, %39 : vector<2x128xf32>
    %42 = arith.divf %40, %41 : vector<2x128xf32>
    %c0_11 = arith.constant 0 : index
    %c0_12 = arith.constant 0 : index
    %c0_13 = arith.constant 0 : index
    %43 = vector.load %arg2[%c0_11, %c0_12, %c0_13] : memref<2x128x256xf32, #tpu.memory_space<vmem>>, vector<2x128x256xf32>
    %44 = vector.shape_cast %42 : vector<2x128xf32> to vector<2x128x1xf32>
    %45 = vector.broadcast %44 : vector<2x128x1xf32> to vector<2x128x256xf32>
    %46 = arith.mulf %43, %45 : vector<2x128x256xf32>
    %c0_14 = arith.constant 0 : index
    %c0_15 = arith.constant 0 : index
    %c0_16 = arith.constant 0 : index
    %47 = vector.load %arg3[%c0_14, %c0_15, %c0_16] : memref<2x128x256xf32, #tpu.memory_space<vmem>>, vector<2x128x256xf32>
    tpu.vector_store %arg3[%c0_14, %c0_15, %c0_16], %46 {strides = array<i32>} : memref<2x128x256xf32, #tpu.memory_space<vmem>>, vector<2x128x256xf32>,
    return
  }
  func.func @transform_0(%arg0: i32) -> i32 {
    %c0_i32 = arith.constant 0 : i32
    %c0_i32_0 = arith.constant 0 : i32
    return %c0_i32 : i32
  }
  func.func @transform_1(%arg0: i32) -> (i32, i32, i32) {
    %c0_i32 = arith.constant 0 : i32
    %c0_i32_0 = arith.constant 0 : i32
    %c0_i32_1 = arith.constant 0 : i32
    return %arg0, %c0_i32, %c0_i32_0 : i32, i32, i32
  }
  func.func @transform_2(%arg0: i32) -> (i32, i32, i32) {
    %c0_i32 = arith.constant 0 : i32
    %c0_i32_0 = arith.constant 0 : i32
    %c0_i32_1 = arith.constant 0 : i32
    return %arg0, %c0_i32, %c0_i32_0 : i32, i32, i32
  }
}

</mosaic_0001>

<bundles_post_ra>
// kernel: tpu_custom_call.1
= control target key start
LH: loop header
LB: loop body
LE: loop exit
PB: predicated region body
PF: predicated region fallthrough
CT: control target
= control target key end

     0   :  { %7 = vsyncpa [#allocation5], 0  ;;  %s2032_s0 = inlined_call_operand.hbm [shape: f32[3], index: 0, kind: input, shape index: {}]   ;;  %s2033_s1 = inlined_call_operand.hbm [shape: f32[2,128,256], index: 1, kind: input, shape index: {}]   ;;  %s2034_s2 = inlined_call_operand.hbm [shape: f32[2,128,256], index: 2, kind: output, shape index: {}]  }
   0x1   :  { %8 = vsyncpa [#allocation3], 0 }
   0x2   :  { %9 = vsyncpa [#allocation4], 0  ;;  %s1608_s11 = scalar_lea.hbm %s2032_s0, 16 }
   0x3   :  { %p1609_p0 = scmp.ne.s32.totalorder %s2032_s0, %s1608_s11  ;;  %p1612_p1 = scmp.lt.u32.totalorder %s1608_s11, %s2032_s0 }
   0x5   :  { %p1614_p2 = pnand %p1612_p1, %p1609_p0 }
   0x7   :  { %1617 = shalt.err (!%p1614_p2)
}
   0x8   :  { %s1668_s16 = smov [#allocation2]   ;;  %s1669_s19 = smov [#allocation6]  }
   0x9   :  { %17 = dma.hbm_to_smem %s2032_s0, 16, %s1668_s16, [#allocation5]  }
   0xa   :  { %s23_s20 = sshll.u32 %s1669_s19, 4  ;;  %s1618_s23 = scalar_lea.hbm %s2033_s1, 8192  ;;  %s24_s20 = int_to_ptr.vmem [resolvable:$true] %s23_s20 }
   0xb   :  { %p1619_p3 = scmp.ne.s32.totalorder %s2033_s1, %s1618_s23  ;;  %p1622_p4 = scmp.lt.u32.totalorder %s1618_s23, %s2033_s1 }
   0xd   :  { %p1624_p5 = pnand %p1622_p4, %p1619_p3 }
   0xf   :  { %1627 = shalt.err (!%p1624_p5)
}
  0x10   :  { %s1628_s28 = scalar_lea.vmem %s24_s20, 8192  ;;  %p1633_p7 = scmp.lt.s32.totalorder %s24_s20, %s24_s20 }
  0x11   :  { %p1629_p6 = scmp.ne.s32.totalorder %s24_s20, %s1628_s28  ;;  %p1634_p8 = scmp.lt.s32.totalorder %s1628_s28, %s1628_s28 }
  0x13   :  { %p1635_p9 = por %p1634_p8, %p1633_p7 }
  0x15   :  { %p1636_p10 = pnand %p1635_p9, %p1629_p6 }
  0x17   :  { %1639 = shalt.err (!%p1636_p10)
}
  0x18   :  { %s1670_s0 = smov 256   ;;  %s1671_s29 = smov 16  }
  0x19   :  { %29 = dma.hbm_to_vmem [thread:$0]  %s2033_s1, 8192, %s24_s20, [#allocation3], %s1670_s0, %s1670_s0, %s1671_s29  }
  0x1a   :  { %1662 = dma.done.wait [#allocation5], 16  }
  0x1b   :  { %1663 = vsyncadd [#allocation5], 4294967280 }
  0x1c   :  { %1664 = dma.done.wait [#allocation3], 8192  }
  0x1d   :  { %1665 = vsyncadd [#allocation3], 4294959104 }
  0x1e   :  { %36 = sfence }
  0x1f   :  { %v41_v0 = vld [vmem:[#allocation6 + $0x20] sm:$0xff]  ;;  %v42_v1 = vld [vmem:[#allocation6 + $0x28] sm:$0xff]  ;;  %v43_v5 = vld [vmem:[#allocation6 + $0x30] sm:$0xff]  ;;  %vm274_vm0 = vcmask 130112   ;;  %vm281_vm1 = vcmask 195712   ;;  %vm288_vm2 = vcmask 261312  }
  0x20   :  { %v37_v2 = vld [vmem:[#allocation6] sm:$0xff]  ;;  %v107_v3 = vadd.f32 %v42_v1, %v41_v0  ;;  %v38_v4 = vld [vmem:[#allocation6 + $0x8] sm:$0xff]  ;;  %v44_v6 = vld [vmem:[#allocation6 + $0x38] sm:$0xff]  ;;  %vm295_vm3 = vcmask 326912   ;;  %vm302_vm4 = vcmask 392512   ;;  %vm309_vm5 = vcmask 458112  }
  0x21   :  { %v101_v7 = vadd.f32 %v38_v4, %v37_v2  ;;  %v39_v8 = vld [vmem:[#allocation6 + $0x10] sm:$0xff]  ;;  %v40_v9 = vld [vmem:[#allocation6 + $0x18] sm:$0xff]  ;;  %v110_v10 = vadd.f32 %v44_v6, %v43_v5  ;;  %v45_v14 = vld [vmem:[#allocation6 + $0x40] sm:$0xff]  ;;  %vm316_vm6 = vcmask 523712   ;;  %vm323_vm7 = vcmask 589312   ;;  %s1672_s1 = smov 1  }
  0x22   :  { %108 = vadd.xlane.f32.xlu1 %v107_v3  ;;  %v104_v11 = vadd.f32 %v40_v9, %v39_v8  ;;  %v47_v12 = vld [vmem:[#allocation6 + $0x50] sm:$0xff]  ;;  %v48_v13 = vld [vmem:[#allocation6 + $0x58] sm:$0xff]  ;;  %v46_v15 = vld [vmem:[#allocation6 + $0x48] sm:$0xff]  ;;  %vm330_vm8 = vcmask 654912   ;;  %vm337_vm9 = vcmask 720512   ;;  %vm344_vm10 = vcmask 786112  }
  0x23   :  { %102 = vadd.xlane.f32.xlu0 %v101_v7  ;;  %v116_v16 = vadd.f32 %v48_v13, %v47_v12  ;;  %v113_v17 = vadd.f32 %v46_v15, %v45_v14  ;;  %v51_v18 = vld [vmem:[#allocation6 + $0x70] sm:$0xff]  ;;  %v52_v19 = vld [vmem:[#allocation6 + $0x78] sm:$0xff]  ;;  %v49_v20 = vld [vmem:[#allocation6 + $0x60] sm:$0xff]  ;;  %vm351_vm11 = vcmask 851712   ;;  %vm358_vm12 = vcmask 917312   ;;  %s1673_s4 = smov 127  }
  0x24   :  { %v50_v21 = vld [vmem:[#allocation6 + $0x68] sm:$0xff]  ;;  %v122_v22 = vadd.f32 %v52_v19, %v51_v18  ;;  %v55_v24 = vld [vmem:[#allocation6 + $0x90] sm:$0xff]  ;;  %v56_v25 = vld [vmem:[#allocation6 + $0x98] sm:$0xff]  ;;  %vm365_vm13 = vcmask 982912   ;;  %vm372_vm14 = vcmask 1048512   ;;  %vm453_vm15 = vcmask 1041409  }
  0x25   :  { %v119_v23 = vadd.f32 %v50_v21, %v49_v20  ;;  %v53_v26 = vld [vmem:[#allocation6 + $0x80] sm:$0xff]  ;;  %v54_v27 = vld [vmem:[#allocation6 + $0x88] sm:$0xff]  ;;  %v128_v28 = vadd.f32 %v56_v25, %v55_v24  ;;  %v59_v30 = vld [vmem:[#allocation6 + $0xb0] sm:$0xff]  ;;  %s462_s5 = sld [smem:[#allocation2]]  ;;  %s1373_s6 = sld [smem:[#allocation2 + $0x2]] }
  0x26   :  { %111 = vadd.xlane.f32.xlu1 %v110_v10  ;;  %v125_v29 = vadd.f32 %v54_v27, %v53_v26  ;;  %v60_v31 = vld [vmem:[#allocation6 + $0xb8] sm:$0xff]  ;;  %v57_v32 = vld [vmem:[#allocation6 + $0xa0] sm:$0xff]  ;;  %v58_v33 = vld [vmem:[#allocation6 + $0xa8] sm:$0xff]  ;;  %s1372_s7 = sld [smem:[#allocation2 + $0x1]]  ;;  %s1675_s8 = smov [#allocation7]  }
  0x27   :  { %105 = vadd.xlane.f32.xlu0 %v104_v11  ;;  %v134_v34 = vadd.f32 %v60_v31, %v59_v30  ;;  %v131_v35 = vadd.f32 %v58_v33, %v57_v32  ;;  %v71_v36 = vld [vmem:[#allocation6 + $0x110] sm:$0xff]  ;;  %v72_v37 = vld [vmem:[#allocation6 + $0x118] sm:$0xff]  ;;  %v69_v38 = vld [vmem:[#allocation6 + $0x100] sm:$0xff]  ;;  %s1359_s9 = sshll.u32 %s1675_s8, 4  ;;  %s1360_s9 = int_to_ptr.vmem [resolvable:$true] %s1359_s9 }
  0x28   :  { %v70_v39 = vld [vmem:[#allocation6 + $0x108] sm:$0xff]  ;;  %v152_v40 = vadd.f32 %v72_v37, %v71_v36  ;;  %v75_v42 = vld [vmem:[#allocation6 + $0x130] sm:$0xff]  ;;  %v76_v43 = vld [vmem:[#allocation6 + $0x138] sm:$0xff]  ;;  %s1640_s10 = scalar_lea.vmem %s1360_s9, 8192  ;;  %p1645_p12 = scmp.lt.s32.totalorder %s1360_s9, %s1360_s9 }
  0x29   :  { %v149_v41 = vadd.f32 %v70_v39, %v69_v38  ;;  %v73_v44 = vld [vmem:[#allocation6 + $0x120] sm:$0xff]  ;;  %v74_v45 = vld [vmem:[#allocation6 + $0x128] sm:$0xff]  ;;  %v158_v46 = vadd.f32 %v76_v43, %v75_v42  ;;  %v79_v48 = vld [vmem:[#allocation6 + $0x150] sm:$0xff]  ;;  %v197_v42 = vlaneseq  ;;  %p1641_p11 = scmp.ne.s32.totalorder %s1360_s9, %s1640_s10  ;;  %p1646_p13 = scmp.lt.s32.totalorder %s1640_s10, %s1640_s10 }
  0x2a   :  { %117 = vadd.xlane.f32.xlu1 %v116_v16  ;;  %v155_v47 = vadd.f32 %v74_v45, %v73_v44  ;;  %v80_v49 = vld [vmem:[#allocation6 + $0x158] sm:$0xff]  ;;  %v77_v50 = vld [vmem:[#allocation6 + $0x140] sm:$0xff]  ;;  %v78_v51 = vld [vmem:[#allocation6 + $0x148] sm:$0xff] }
  0x2b   :  { %114 = vadd.xlane.f32.xlu0 %v113_v17  ;;  %v164_v52 = vadd.f32 %v80_v49, %v79_v48  ;;  %v161_v53 = vadd.f32 %v78_v51, %v77_v50  ;;  %v83_v54 = vld [vmem:[#allocation6 + $0x170] sm:$0xff]  ;;  %v84_v55 = vld [vmem:[#allocation6 + $0x178] sm:$0xff]  ;;  %v81_v56 = vld [vmem:[#allocation6 + $0x160] sm:$0xff]  ;;  %v1742_v45 = vand.u32 127, %v197_v42  ;;  %v1749_v49 = vshrl.u32 %v197_v42, 7  ;;  %p1647_p0 = por %p1646_p13, %p1645_p12 }
  0x2c   :  { %v82_v57 = vld [vmem:[#allocation6 + $0x168] sm:$0xff]  ;;  %v170_v58 = vadd.f32 %v84_v55, %v83_v54  ;;  %v87_v60 = vld [vmem:[#allocation6 + $0x190] sm:$0xff]  ;;  %v88_v61 = vld [vmem:[#allocation6 + $0x198] sm:$0xff] }
  0x2d   :  { %v167_v59 = vadd.f32 %v82_v57, %v81_v56  ;;  %v85_v62 = vld [vmem:[#allocation6 + $0x180] sm:$0xff]  ;;  %v86_v63 = vld [vmem:[#allocation6 + $0x188] sm:$0xff]  ;;  %v176_v0 = vadd.f32 %v88_v61, %v87_v60  ;;  %v91_v2 = vld [vmem:[#allocation6 + $0x1b0] sm:$0xff]  ;;  %v267_v54 = vsub.s32 %v1742_v45, %v1749_v49  ;;  %v283_v55 = vadd.s32 4294967272, %v1742_v45  ;;  %p1648_p1 = pnand %p1647_p0, %p1641_p11 }
  0x2e   :  { %123 = vadd.xlane.f32.xlu1 %v122_v22  ;;  %v173_v1 = vadd.f32 %v86_v63, %v85_v62  ;;  %v92_v3 = vld [vmem:[#allocation6 + $0x1b8] sm:$0xff]  ;;  %v89_v4 = vld [vmem:[#allocation6 + $0x1a0] sm:$0xff]  ;;  %v90_v5 = vld [vmem:[#allocation6 + $0x1a8] sm:$0xff] }
  0x2f   :  { %120 = vadd.xlane.f32.xlu0 %v119_v23  ;;  %v182_v6 = vadd.f32 %v92_v3, %v91_v2  ;;  %v179_v7 = vadd.f32 %v90_v5, %v89_v4  ;;  %v93_v8 = vld [vmem:[#allocation6 + $0x1c0] sm:$0xff]  ;;  %v94_v9 = vld [vmem:[#allocation6 + $0x1c8] sm:$0xff]  ;;  %v95_v14 = vld [vmem:[#allocation6 + $0x1d0] sm:$0xff]  ;;  %v286_v62 = vsub.s32 %v283_v55, %v1749_v49  ;;  %v297_v2 = vadd.s32 4294967256, %v1742_v45 }
  0x30   :  { %v61_v10 = vld [vmem:[#allocation6 + $0xc0] sm:$0xff]  ;;  %v62_v11 = vld [vmem:[#allocation6 + $0xc8] sm:$0xff]  ;;  %v185_v12 = vadd.f32 %v94_v9, %v93_v8  ;;  %v96_v15 = vld [vmem:[#allocation6 + $0x1d8] sm:$0xff]  ;;  %v339_v55 = vadd.s32 4294967208, %v1742_v45 }
  0x31   :  { %v137_v13 = vadd.f32 %v62_v11, %v61_v10  ;;  %v63_v16 = vld [vmem:[#allocation6 + $0xd0] sm:$0xff]  ;;  %v64_v17 = vld [vmem:[#allocation6 + $0xd8] sm:$0xff]  ;;  %v188_v18 = vadd.f32 %v96_v15, %v95_v14  ;;  %v97_v20 = vld [vmem:[#allocation6 + $0x1e0] sm:$0xff]  ;;  %v311_v10 = vadd.s32 4294967240, %v1742_v45  ;;  %v300_v14 = vsub.s32 %v297_v2, %v1749_v49 }
  0x32   :  { %129 = vadd.xlane.f32.xlu1 %v128_v28  ;;  %v140_v19 = vadd.f32 %v64_v17, %v63_v16  ;;  %v98_v21 = vld [vmem:[#allocation6 + $0x1e8] sm:$0xff]  ;;  %v65_v22 = vld [vmem:[#allocation6 + $0xe0] sm:$0xff]  ;;  %v99_v26 = vld [vmem:[#allocation6 + $0x1f0] sm:$0xff] }
  0x33   :  { %126 = vadd.xlane.f32.xlu0 %v125_v29  ;;  %v66_v23 = vld [vmem:[#allocation6 + $0xe8] sm:$0xff]  ;;  %v191_v24 = vadd.f32 %v98_v21, %v97_v20  ;;  %v100_v27 = vld [vmem:[#allocation6 + $0x1f8] sm:$0xff]  ;;  %v67_v28 = vld [vmem:[#allocation6 + $0xf0] sm:$0xff]  ;;  %v318_v20 = vadd.s32 4294967232, %v1742_v45 }
  0x34   :  { %v143_v25 = vadd.f32 %v66_v23, %v65_v22  ;;  %v68_v29 = vld [vmem:[#allocation6 + $0xf8] sm:$0xff]  ;;  %v194_v30 = vadd.f32 %v100_v27, %v99_v26  ;;  %v325_v23 = vadd.s32 4294967224, %v1742_v45 }
  0x35   :  { %v146_v31 = vadd.f32 %v68_v29, %v67_v28 }
  0x36   :  { %135 = vadd.xlane.f32.xlu1 %v134_v34 }
  0x37   :  { %132 = vadd.xlane.f32.xlu0 %v131_v35 }
  0x3a   :  { %153 = vadd.xlane.f32.xlu1 %v152_v40 }
  0x3b   :  { %150 = vadd.xlane.f32.xlu0 %v149_v41 }
  0x3e   :  { %159 = vadd.xlane.f32.xlu1 %v158_v46  ;;  %v269_v46 = vadd.s32 4294967288, %v1742_v45 }
  0x3f   :  { %156 = vadd.xlane.f32.xlu0 %v155_v47 }
  0x40   :  { %v272_v50 = vsub.s32 %v269_v46, %v1749_v49  ;;  %v321_v46 = vsub.s32 %v318_v20, %v1749_v49 }
  0x42   :  { %165 = vadd.xlane.f32.xlu1 %v164_v52  ;;  %v276_v52 = vadd.s32 4294967280, %v1742_v45 }
  0x43   :  { %162 = vadd.xlane.f32.xlu0 %v161_v53 }
  0x46   :  { %171 = vadd.xlane.f32.xlu1 %v170_v58  ;;  %v279_v58 = vsub.s32 %v276_v52, %v1749_v49 }
  0x47   :  { %168 = vadd.xlane.f32.xlu0 %v167_v59  ;;  %v290_v59 = vadd.s32 4294967264, %v1742_v45 }
  0x4a   :  { %177 = vadd.xlane.f32.xlu1 %v176_v0 }
  0x4b   :  { %174 = vadd.xlane.f32.xlu0 %v173_v1 }
  0x4e   :  { %183 = vadd.xlane.f32.xlu1 %v182_v6  ;;  %v293_v6 = vsub.s32 %v290_v59, %v1749_v49  ;;  %v346_v59 = vadd.s32 4294967200, %v1742_v45 }
  0x4f   :  { %180 = vadd.xlane.f32.xlu0 %v179_v7  ;;  %v304_v7 = vadd.s32 4294967248, %v1742_v45 }
  0x52   :  { %186 = vadd.xlane.f32.xlu1 %v185_v12 }
  0x53   :  { %138 = vadd.xlane.f32.xlu0 %v137_v13 }
  0x56   :  { %189 = vadd.xlane.f32.xlu1 %v188_v18 }
  0x57   :  { %141 = vadd.xlane.f32.xlu0 %v140_v19  ;;  %v307_v19 = vsub.s32 %v304_v7, %v1749_v49  ;;  %v353_v7 = vadd.s32 4294967192, %v1742_v45 }
  0x5a   :  { %192 = vadd.xlane.f32.xlu1 %v191_v24  ;;  %v314_v24 = vsub.s32 %v311_v10, %v1749_v49  ;;  %v360_v10 = vadd.s32 4294967184, %v1742_v45 }
  0x5b   :  { %144 = vadd.xlane.f32.xlu0 %v143_v25 }
  0x5e   :  { %195 = vadd.xlane.f32.xlu1 %v194_v30 }
  0x5f   :  { %147 = vadd.xlane.f32.xlu0 %v146_v31 }
  0xaf   :  { %v1718_v32 = vpop.xlane.xlu1 %108 }
  0xb0   :  { %v1720_v33 = vpop.xlane.xlu0 %102  ;;  %v280_v5 = vrot.slane %v1718_v32, %v279_v58 }
  0xb1   :  { %v268_v61 = vrot.slane %v1720_v33, %v267_v54 }
  0xb3   :  { %v1722_v34 = vpop.xlane.xlu1 %111 }
  0xb4   :  { %v1724_v35 = vpop.xlane.xlu0 %105  ;;  %v287_v13 = vrot.slane %v1722_v34, %v286_v62 }
  0xb5   :  { %v273_v56 = vrot.slane %v1724_v35, %v272_v50 }
  0xb7   :  { %v1726_v36 = vpop.xlane.xlu1 %117  ;;  %v275_v1 = vsel %vm274_vm0, %v273_v56, %v268_v61 }
  0xb8   :  { %v1728_v37 = vpop.xlane.xlu0 %114  ;;  %v282_v9 = vsel %vm281_vm1, %v280_v5, %v275_v1  ;;  %v301_v27 = vrot.slane %v1726_v36, %v300_v14 }
  0xb9   :  { %v294_v18 = vrot.slane %v1728_v37, %v293_v6  ;;  %v289_v22 = vsel %vm288_vm2, %v287_v13, %v282_v9  ;;  %v342_v9 = vsub.s32 %v339_v55, %v1749_v49  ;;  %v349_v13 = vsub.s32 %v346_v59, %v1749_v49 }
  0xbb   :  { %v1730_v38 = vpop.xlane.xlu1 %123  ;;  %v296_v31 = vsel %vm295_vm3, %v294_v18, %v289_v22 }
  0xbc   :  { %v1732_v39 = vpop.xlane.xlu0 %120  ;;  %v315_v61 = vrot.slane %v1730_v38, %v314_v24 }
  0xbd   :  { %v308_v42 = vrot.slane %v1732_v39, %v307_v19 }
  0xbf   :  { %v1734_v40 = vpop.xlane.xlu1 %129 }
  0xc0   :  { %v1736_v41 = vpop.xlane.xlu0 %126 }
  0xc3   :  { %v1738_v43 = vpop.xlane.xlu1 %135 }
  0xc4   :  { %v1740_v44 = vpop.xlane.xlu0 %132 }
  0xc7   :  { %v1745_v47 = vpop.xlane.xlu1 %153 }
  0xc8   :  { %v1747_v48 = vpop.xlane.xlu0 %150  ;;  %v381_v63 = vrot.slane %v1745_v47, %v272_v50  ;;  %v332_v50 = vadd.s32 4294967216, %v1742_v45 }
  0xc9   :  { %v377_v0 = vrot.slane %v1747_v48, %v267_v54  ;;  %v328_v54 = vsub.s32 %v325_v23, %v1749_v49  ;;  %v356_v23 = vsub.s32 %v353_v7, %v1749_v49 }
  0xca   :  { %v335_v5 = vsub.s32 %v332_v50, %v1749_v49 }
  0xcb   :  { %v1752_v51 = vpop.xlane.xlu1 %159  ;;  %v382_v11 = vsel %vm274_vm0, %v381_v63, %v377_v0 }
  0xcc   :  { %v1755_v53 = vpop.xlane.xlu0 %156  ;;  %v391_v12 = vrot.slane %v1752_v51, %v286_v62  ;;  %v303_v62 = vsel %vm302_vm4, %v301_v27, %v296_v31  ;;  %v336_v22 = vrot.slane %v1740_v44, %v335_v5 }
  0xcd   :  { %v386_v3 = vrot.slane %v1755_v53, %v279_v58  ;;  %v310_v2 = vsel %vm309_vm5, %v308_v42, %v303_v62 }
  0xcf   :  { %v1761_v57 = vpop.xlane.xlu1 %165  ;;  %v387_v15 = vsel %vm281_vm1, %v386_v3, %v382_v11  ;;  %v322_v3 = vrot.slane %v1736_v41, %v321_v46 }
  0xd0   :  { %v1765_v60 = vpop.xlane.xlu0 %162  ;;  %v401_v25 = vrot.slane %v1761_v57, %v300_v14  ;;  %v392_v26 = vsel %vm288_vm2, %v391_v12, %v387_v15  ;;  %v329_v14 = vrot.slane %v1734_v40, %v328_v54  ;;  %v317_v15 = vsel %vm316_vm6, %v315_v61, %v310_v2 }
  0xd1   :  { %v396_v16 = vrot.slane %v1765_v60, %v293_v6  ;;  %v324_v20 = vsel %vm323_vm7, %v322_v3, %v317_v15 }
  0xd2   :  { %v331_v31 = vsel %vm330_vm8, %v329_v14, %v324_v20 }
  0xd3   :  { %v1774_v4 = vpop.xlane.xlu1 %171  ;;  %v397_v28 = vsel %vm295_vm3, %v396_v16, %v392_v26  ;;  %v363_v26 = vsub.s32 %v360_v10, %v1749_v49 }
  0xd4   :  { %v1779_v8 = vpop.xlane.xlu0 %168  ;;  %v411_v56 = vrot.slane %v1774_v4, %v314_v24  ;;  %v402_v58 = vsel %vm302_vm4, %v401_v25, %v397_v28  ;;  %v367_v25 = vadd.s32 4294967176, %v1742_v45 }
  0xd5   :  { %v406_v29 = vrot.slane %v1779_v8, %v307_v19 }
  0xd6   :  { %v370_v59 = vsub.s32 %v367_v25, %v1749_v49  ;;  %v469_v25 = vsub.s32 0, %v1749_v49 }
  0xd7   :  { %v1789_v17 = vpop.xlane.xlu1 %177  ;;  %v407_v63 = vsel %vm309_vm5, %v406_v29, %v402_v58  ;;  %v343_v29 = vrot.slane %v1738_v43, %v342_v9 }
  0xd8   :  { %2039 = vst [vmem:[#allocation11_spill] sm:$0xff] %v1789_v17  ;;  %v1794_v21 = vpop.xlane.xlu0 %174  ;;  %v421_v11 = vrot.slane %v1789_v17, %v328_v54  ;;  %v412_v12 = vsel %vm316_vm6, %v411_v56, %v407_v63  ;;  %v338_v54 = vsel %vm337_vm9, %v336_v22, %v331_v31  ;;  %v458_v22 = vadd.s32 4294967295, %v1742_v45 }
  0xd9   :  { %v416_v0 = vrot.slane %v1794_v21, %v321_v46  ;;  %v345_v3 = vsel %vm344_vm10, %v343_v29, %v338_v54  ;;  %v536_v31 = vsub.s32 1, %v1749_v49 }
  0xda   :  { %vm459_vm0 = vcmp.ge.s32.totalorder %v458_v22, 0 }
  0xdb   :  { %v1803_v30 = vpop.xlane.xlu1 %183  ;;  %v417_v16 = vsel %vm323_vm7, %v416_v0, %v412_v12 }
  0xdc   :  { %2040 = vst [vmem:[#allocation12_spill] sm:$0xff] %v1803_v30  ;;  %v1808_v52 = vpop.xlane.xlu0 %180  ;;  %v431_v27 = vrot.slane %v1803_v30, %v342_v9  ;;  %v422_v28 = vsel %vm330_vm8, %v421_v11, %v417_v16 }
  0xdd   :  { %v426_v18 = vrot.slane %v1808_v52, %v335_v5 }
  0xdf   :  { %v1818_v1 = vpop.xlane.xlu1 %186  ;;  %v427_v42 = vsel %vm337_vm9, %v426_v18, %v422_v28 }
  0xe0   :  { %v1822_v6 = vpop.xlane.xlu0 %138  ;;  %v436_v46 = vrot.slane %v1818_v1, %v349_v13  ;;  %v432_v63 = vsel %vm344_vm10, %v431_v27, %v427_v42 }
  0xe1   :  { %v350_v55 = vrot.slane %v1822_v6, %v349_v13 }
  0xe2   :  { %v437_v2 = vsel %vm351_vm11, %v436_v46, %v432_v63  ;;  %v667_v46 = vadd.s32 1, %v1742_v45  ;;  %v1674_v45 = vmov 0  }
  0xe3   :  { %v1833_v19 = vpop.xlane.xlu1 %189  ;;  %v352_v7 = vsel %vm351_vm11, %v350_v55, %v345_v3  ;;  %v673_v55 = vstv %s1373_s6  ;;  %1414 = vset.pattern.permute.xlu0 %v1674_v45  ;;  %1415 = vset.pattern.permute.xlu1 %v1674_v45 }
  0xe4   :  { %2041 = vst [vmem:[#allocation13_spill] sm:$0xff] %v1833_v19  ;;  %v1837_v24 = vpop.xlane.xlu0 %141  ;;  %v441_v56 = vrot.slane %v1833_v19, %v356_v23  ;;  %vm669_vm1 = vcmp.lt.s32.totalorder %v667_v46, 128 }
  0xe5   :  { %v357_v61 = vrot.slane %v1837_v24, %v356_v23  ;;  %v464_v23 = vstv %s462_s5 }
  0xe6   :  { %v442_v9 = vsel %vm358_vm12, %v441_v56, %v437_v2 }
  0xe7   :  { %v1846_v50 = vpop.xlane.xlu1 %192  ;;  %v359_v12 = vsel %vm358_vm12, %v357_v61, %v352_v7 }
  0xe8   :  { %v1850_v58 = vpop.xlane.xlu0 %144  ;;  %v446_v62 = vrot.slane %v1846_v50, %v363_v26 }
  0xe9   :  { %v364_v0 = vrot.slane %v1850_v58, %v363_v26 }
  0xea   :  { %v447_v14 = vsel %vm365_vm13, %v446_v62, %v442_v9 }
  0xeb   :  { %v1859_v5 = vpop.xlane.xlu1 %195  ;;  %v366_v15 = vsel %vm365_vm13, %v364_v0, %v359_v12 }
  0xec   :  { %2042 = vst [vmem:[#allocation14_spill] sm:$0xff] %v1859_v5  ;;  %v451_v10 = vrot.slane %v1859_v5, %v370_v59  ;;  %v1863_v11 = vpop.xlane.xlu0 %147 }
  0xed   :  { %v371_v13 = vrot.slane %v1863_v11, %v370_v59 }
  0xee   :  { %v452_v16 = vsel %vm372_vm14, %v451_v10, %v447_v14 }
  0xef   :  { %v373_v18 = vsel %vm372_vm14, %v371_v13, %v366_v15 }
  0xf0   :  { %v454_v20 = vsel %vm453_vm15, %v452_v16, %v373_v18 }
  0xf1   :  { %456 = vrot.lane.b32.xlu0 %v454_v20, %s1672_s1 }
  0xf5   :  { %665 = vrot.lane.b32.xlu0 %v454_v20, %s1673_s4 }
 0x163   :  { %v457_v26 = vpop.permute.xlu0 %456 }
 0x164   :  { %v463_v27 = vsel %vm459_vm0, %v457_v26, 0.0 }
 0x165   :  { %v465_v28 = vmul.f32 %v464_v23, %v463_v27 }
 0x167   :  { %v470_v29 = vrot.slane %v465_v28, %v469_v25  ;;  %v537_v42 = vrot.slane %v465_v28, %v536_v31  ;;  %v666_v54 = vpop.permute.xlu0 %665  ;;  %v1900_v28 = vstv %s1372_s7 }
 0x168   :  { %v672_v49 = vsel %vm669_vm1, %v666_v54, 0.0  ;;  %v227_v54 = vmul.f32 %v1900_v28, %v1808_v52  ;;  %v201_v52 = vmul.f32 %v1900_v28, %v1720_v33 }
 0x169   :  { %484 = vbcast.lane.b32.xlu0 %v470_v29, 280  ;;  %472 = vbcast.lane.b32.xlu1 %v470_v29, 256  ;;  %v674_v56 = vmul.f32 %v673_v55, %v672_v49 }
 0x16b   :  { %v679_v59 = vrot.slane %v674_v56, %v469_v25  ;;  %v746_v61 = vrot.slane %v674_v56, %v536_v31 }
 0x16d   :  { %492 = vbcast.lane.b32.xlu0 %v470_v29, 296  ;;  %476 = vbcast.lane.b32.xlu1 %v470_v29, 264 }
 0x171   :  { %500 = vbcast.lane.b32.xlu0 %v470_v29, 312  ;;  %480 = vbcast.lane.b32.xlu1 %v470_v29, 272 }
 0x175   :  { %508 = vbcast.lane.b32.xlu0 %v470_v29, 328  ;;  %488 = vbcast.lane.b32.xlu1 %v470_v29, 288 }
 0x179   :  { %516 = vbcast.lane.b32.xlu0 %v470_v29, 344  ;;  %496 = vbcast.lane.b32.xlu1 %v470_v29, 304 }
 0x17d   :  { %524 = vbcast.lane.b32.xlu0 %v470_v29, 360  ;;  %504 = vbcast.lane.b32.xlu1 %v470_v29, 320 }
 0x181   :  { %532 = vbcast.lane.b32.xlu0 %v470_v29, 376  ;;  %512 = vbcast.lane.b32.xlu1 %v470_v29, 336 }
 0x185   :  { %543 = vbcast.lane.b32.xlu0 %v537_v42, 264  ;;  %520 = vbcast.lane.b32.xlu1 %v470_v29, 352 }
 0x189   :  { %551 = vbcast.lane.b32.xlu0 %v537_v42, 280  ;;  %528 = vbcast.lane.b32.xlu1 %v470_v29, 368  ;;  %v225_v29 = vmul.f32 %v1900_v28, %v1794_v21 }
 0x18d   :  { %563 = vbcast.lane.b32.xlu0 %v537_v42, 304  ;;  %539 = vbcast.lane.b32.xlu1 %v537_v42, 256 }
 0x191   :  { %571 = vbcast.lane.b32.xlu0 %v537_v42, 320  ;;  %547 = vbcast.lane.b32.xlu1 %v537_v42, 272 }
 0x195   :  { %579 = vbcast.lane.b32.xlu0 %v537_v42, 336  ;;  %555 = vbcast.lane.b32.xlu1 %v537_v42, 288 }
 0x199   :  { %587 = vbcast.lane.b32.xlu0 %v537_v42, 352  ;;  %559 = vbcast.lane.b32.xlu1 %v537_v42, 296 }
 0x19d   :  { %595 = vbcast.lane.b32.xlu0 %v537_v42, 368  ;;  %567 = vbcast.lane.b32.xlu1 %v537_v42, 312 }
 0x1a1   :  { %575 = vbcast.lane.b32.xlu1 %v537_v42, 328  ;;  %681 = vbcast.lane.b32.xlu0 %v679_v59, 256 }
 0x1a5   :  { %583 = vbcast.lane.b32.xlu1 %v537_v42, 344  ;;  %689 = vbcast.lane.b32.xlu0 %v679_v59, 272 }
 0x1a9   :  { %591 = vbcast.lane.b32.xlu1 %v537_v42, 360  ;;  %697 = vbcast.lane.b32.xlu0 %v679_v59, 288 }
 0x1ad   :  { %599 = vbcast.lane.b32.xlu1 %v537_v42, 376  ;;  %705 = vbcast.lane.b32.xlu0 %v679_v59, 304 }
 0x1b1   :  { %685 = vbcast.lane.b32.xlu1 %v679_v59, 264  ;;  %713 = vbcast.lane.b32.xlu0 %v679_v59, 320 }
 0x1b5   :  { %693 = vbcast.lane.b32.xlu1 %v679_v59, 280  ;;  %721 = vbcast.lane.b32.xlu0 %v679_v59, 336 }
 0x1b9   :  { %701 = vbcast.lane.b32.xlu1 %v679_v59, 296  ;;  %729 = vbcast.lane.b32.xlu0 %v679_v59, 352 }
 0x1bd   :  { %709 = vbcast.lane.b32.xlu1 %v679_v59, 312  ;;  %737 = vbcast.lane.b32.xlu0 %v679_v59, 368 }
 0x1c1   :  { %717 = vbcast.lane.b32.xlu1 %v679_v59, 328  ;;  %748 = vbcast.lane.b32.xlu0 %v746_v61, 256 }
 0x1c5   :  { %725 = vbcast.lane.b32.xlu1 %v679_v59, 344  ;;  %756 = vbcast.lane.b32.xlu0 %v746_v61, 272 }
 0x1c9   :  { %733 = vbcast.lane.b32.xlu1 %v679_v59, 360  ;;  %764 = vbcast.lane.b32.xlu0 %v746_v61, 288 }
 0x1cd   :  { %741 = vbcast.lane.b32.xlu1 %v679_v59, 376  ;;  %772 = vbcast.lane.b32.xlu0 %v746_v61, 304  ;;  %v229_v59 = vmul.f32 %v1900_v28, %v1818_v1 }
 0x1d1   :  { %752 = vbcast.lane.b32.xlu1 %v746_v61, 264  ;;  %780 = vbcast.lane.b32.xlu0 %v746_v61, 320 }
 0x1d5   :  { %760 = vbcast.lane.b32.xlu1 %v746_v61, 280  ;;  %788 = vbcast.lane.b32.xlu0 %v746_v61, 336 }
 0x1d9   :  { %768 = vbcast.lane.b32.xlu1 %v746_v61, 296  ;;  %796 = vbcast.lane.b32.xlu0 %v746_v61, 352 }
 0x1db   :  { %v473_v62 = vpop.permute.xlu1 %472  ;;  %v1870_v63 = vpop.permute.xlu0 %484 }
 0x1dd   :  { %776 = vbcast.lane.b32.xlu1 %v746_v61, 312  ;;  %804 = vbcast.lane.b32.xlu0 %v746_v61, 368 }
 0x1df   :  { %v1872_v0 = vpop.permute.xlu1 %476  ;;  %v1874_v2 = vpop.permute.xlu0 %492 }
 0x1e1   :  { %784 = vbcast.lane.b32.xlu1 %v746_v61, 328 }
 0x1e3   :  { %v481_v3 = vpop.permute.xlu1 %480  ;;  %v1876_v7 = vpop.permute.xlu0 %500 }
 0x1e5   :  { %792 = vbcast.lane.b32.xlu1 %v746_v61, 344 }
 0x1e7   :  { %v489_v9 = vpop.permute.xlu1 %488  ;;  %v1878_v10 = vpop.permute.xlu0 %508 }
 0x1e9   :  { %800 = vbcast.lane.b32.xlu1 %v746_v61, 360 }
 0x1eb   :  { %v497_v12 = vpop.permute.xlu1 %496  ;;  %v1880_v13 = vpop.permute.xlu0 %516 }
 0x1ed   :  { %808 = vbcast.lane.b32.xlu1 %v746_v61, 376 }
 0x1ef   :  { %v505_v14 = vpop.permute.xlu1 %504  ;;  %v1882_v15 = vpop.permute.xlu0 %524 }
 0x1f3   :  { %v1884_v16 = vpop.permute.xlu1 %512  ;;  %v1886_v18 = vpop.permute.xlu0 %532 }
 0x1f7   :  { %v1888_v20 = vpop.permute.xlu1 %520  ;;  %v1890_v22 = vpop.permute.xlu0 %543 }
 0x1fb   :  { %v1892_v23 = vpop.permute.xlu1 %528  ;;  %v1894_v25 = vpop.permute.xlu0 %551 }
 0x1ff   :  { %v1896_v26 = vpop.permute.xlu1 %539  ;;  %v1898_v27 = vpop.permute.xlu0 %563 }
 0x203   :  { %v1904_v31 = vpop.permute.xlu1 %547  ;;  %v572_v42 = vpop.permute.xlu0 %571 }
 0x204   :  { %v1906_v46 = vadd.f32 %v572_v42, %v225_v29  ;;  %v231_v29 = vmul.f32 %v1900_v28, %v1846_v50  ;;  %v203_v50 = vmul.f32 %v1900_v28, %v1718_v32 }
 0x207   :  { %v1910_v55 = vpop.permute.xlu1 %555  ;;  %v580_v49 = vpop.permute.xlu0 %579 }
 0x208   :  { %v1912_v56 = vadd.f32 %v580_v49, %v227_v54  ;;  %v633_v54 = vadd.f32 %v473_v62, %v201_v52  ;;  %v207_v62 = vmul.f32 %v1900_v28, %v1732_v39 }
 0x20a   :  { %2043 = vst [vmem:[#allocation15_spill] sm:$0xff] %v1912_v56  ;;  %v639_v32 = vadd.f32 %v497_v12, %v207_v62 }
 0x20b   :  { %v1916_v45 = vpop.permute.xlu1 %559  ;;  %v588_v61 = vpop.permute.xlu0 %587 }
 0x20c   :  { %v1918_v21 = vadd.f32 %v588_v61, %v229_v59  ;;  %v635_v61 = vadd.f32 %v481_v3, %v203_v50 }
 0x20e   :  { %2044 = vst [vmem:[#allocation16_spill] sm:$0xff] %v1918_v21 }
 0x20f   :  { %v1922_v42 = vpop.permute.xlu1 %567  ;;  %v596_v5 = vpop.permute.xlu0 %595 }
 0x210   :  { %2045 = vst [vmem:[#allocation17_spill] sm:$0xff] %v1922_v42  ;;  %v1926_v19 = vadd.f32 %v596_v5, %v231_v29  ;;  %v205_v5 = vmul.f32 %v1900_v28, %v1728_v37 }
 0x212   :  { %v637_v29 = vadd.f32 %v489_v9, %v205_v5  ;;  %v204_v9 = vmul.f32 %v1900_v28, %v1722_v34 }
 0x213   :  { %v1928_v49 = vpop.permute.xlu1 %575  ;;  %v682_v1 = vpop.permute.xlu0 %681 }
 0x214   :  { %v842_v30 = vadd.f32 %v682_v1, %v633_v54  ;;  %v202_v54 = vmul.f32 %v1900_v28, %v1724_v35  ;;  %v636_v12 = vadd.f32 %v1870_v63, %v204_v9  ;;  %v210_v9 = vmul.f32 %v1900_v28, %v1734_v40 }
 0x216   :  { %v1374_v17 = vmul.f32 -1.442695, %v842_v30  ;;  %v634_v50 = vadd.f32 %v1872_v0, %v202_v54 }
 0x217   :  { %v1930_v56 = vpop.permute.xlu1 %583  ;;  %v690_v59 = vpop.permute.xlu0 %689 }
 0x218   :  { %1416 = vpow2.f32 %v1374_v17  ;;  %v844_v33 = vadd.f32 %v690_v59, %v635_v61  ;;  %v209_v59 = vmul.f32 %v1900_v28, %v1736_v41  ;;  %v211_v41 = vmul.f32 %v1900_v28, %v1740_v44 }
 0x21a   :  { %v1376_v17 = vmul.f32 -1.442695, %v844_v33  ;;  %v641_v5 = vadd.f32 %v505_v14, %v209_v59  ;;  %v643_v14 = vadd.f32 %v1884_v16, %v211_v41 }
 0x21b   :  { %v1934_v21 = vpop.permute.xlu1 %591  ;;  %v698_v42 = vpop.permute.xlu0 %697 }
 0x21c   :  { %2046 = vst [vmem:[#allocation18_spill] sm:$0xff] %v1934_v21  ;;  %v846_v3 = vadd.f32 %v698_v42, %v637_v29  ;;  %1418 = vpow2.f32 %v1376_v17 }
 0x21e   :  { %v1378_v35 = vmul.f32 -1.442695, %v846_v3  ;;  %v208_v3 = vmul.f32 %v1900_v28, %v1730_v38 }
 0x21f   :  { %v1940_v30 = vpop.permute.xlu1 %599  ;;  %v706_v52 = vpop.permute.xlu0 %705 }
 0x220   :  { %2047 = vst [vmem:[#allocation19_spill] sm:$0xff] %v1940_v30  ;;  %v848_v37 = vadd.f32 %v706_v52, %v639_v32  ;;  %v206_v52 = vmul.f32 %v1900_v28, %v1726_v36 }
 0x222   :  { %v1417_v1 = vpop.eup %1416  ;;  %v1380_v42 = vmul.f32 -1.442695, %v848_v37 }
 0x223   :  { %v970_v61 = vadd.f32 1.0, %v1417_v1  ;;  %v686_v21 = vpop.permute.xlu1 %685  ;;  %v714_v39 = vpop.permute.xlu0 %713 }
 0x224   :  { %v843_v30 = vadd.f32 %v686_v21, %v634_v50  ;;  %v850_v0 = vadd.f32 %v714_v39, %v641_v5  ;;  %v638_v21 = vadd.f32 %v1874_v2, %v206_v52  ;;  %v640_v50 = vadd.f32 %v1876_v7, %v208_v3 }
 0x225   :  { %1420 = vrcp.f32 %v970_v61 }
 0x226   :  { %v1375_v33 = vmul.f32 -1.442695, %v843_v30  ;;  %v1382_v63 = vmul.f32 -1.442695, %v850_v0  ;;  %v213_v30 = vmul.f32 %v1900_v28, %v1822_v6  ;;  %v1419_v16 = vpop.eup %1418 }
 0x227   :  { %v694_v62 = vpop.permute.xlu1 %693  ;;  %v722_v29 = vpop.permute.xlu0 %721  ;;  %v972_v7 = vadd.f32 1.0, %v1419_v16 }
 0x228   :  { %1422 = vpow2.f32 %v1375_v33  ;;  %v845_v34 = vadd.f32 %v694_v62, %v636_v12  ;;  %v852_v32 = vadd.f32 %v722_v29, %v643_v14  ;;  %v645_v1 = vadd.f32 %v1888_v20, %v213_v30 }
 0x229   :  { %1424 = vpow2.f32 %v1378_v35  ;;  %v642_v35 = vadd.f32 %v1878_v10, %v210_v9  ;;  %v215_v20 = vmul.f32 %v1900_v28, %v1850_v58  ;;  %v212_v33 = vmul.f32 %v1900_v28, %v1738_v43 }
 0x22a   :  { %1426 = vpow2.f32 %v1380_v42  ;;  %v1377_v54 = vmul.f32 -1.442695, %v845_v34  ;;  %v1384_v37 = vmul.f32 -1.442695, %v852_v32  ;;  %v217_v58 = vmul.f32 %v1900_v28, %v1747_v48 }
 0x22b   :  { %v702_v44 = vpop.permute.xlu1 %701  ;;  %v730_v17 = vpop.permute.xlu0 %729  ;;  %v647_v52 = vadd.f32 %v1892_v23, %v215_v20  ;;  %v644_v10 = vadd.f32 %v1880_v13, %v212_v33  ;;  %v219_v14 = vmul.f32 %v1900_v28, %v1755_v53  ;;  %v214_v30 = vmul.f32 %v1900_v28, %v1837_v24 }
 0x22c   :  { %1428 = vpow2.f32 %v1377_v54  ;;  %v847_v36 = vadd.f32 %v702_v44, %v638_v21  ;;  %v854_v61 = vadd.f32 %v730_v17, %v645_v1  ;;  %v649_v48 = vadd.f32 %v1896_v26, %v217_v58 }
 0x22d   :  { %1430 = vpow2.f32 %v1382_v63  ;;  %v646_v53 = vadd.f32 %v1882_v15, %v214_v30  ;;  %v221_v1 = vmul.f32 %v1900_v28, %v1765_v60  ;;  %v216_v15 = vmul.f32 %v1900_v28, %v1863_v11 }
 0x22e   :  { %v1379_v2 = vmul.f32 -1.442695, %v847_v36  ;;  %v1386_v41 = vmul.f32 -1.442695, %v854_v61  ;;  %v651_v36 = vadd.f32 %v1904_v31, %v219_v14  ;;  %v223_v60 = vmul.f32 %v1900_v28, %v1779_v8 }
 0x22f   :  { %v1421_v59 = vpop.eup %1420  ;;  %v710_v39 = vpop.permute.xlu1 %709  ;;  %v653_v9 = vadd.f32 %v1910_v55, %v221_v1  ;;  %v218_v8 = vmul.f32 %v1900_v28, %v1745_v47 }
 0x230   :  { %v738_v6 = vpop.permute.xlu0 %737  ;;  %1432 = vpow2.f32 %v1379_v2  ;;  %v849_v5 = vadd.f32 %v710_v39, %v640_v50  ;;  %1068 = vperm.xlu0 %1414, %v1421_v59  }
 0x231   :  { %1434 = vpow2.f32 %v1384_v37  ;;  %v856_v63 = vadd.f32 %v738_v6, %v647_v52 }
 0x232   :  { %v1423_v38 = vpop.eup %1422  ;;  %v1381_v12 = vmul.f32 -1.442695, %v849_v5 }
 0x233   :  { %v1425_v42 = vpop.eup %1424  ;;  %v971_v0 = vadd.f32 1.0, %v1423_v38  ;;  %v718_v62 = vpop.permute.xlu1 %717  ;;  %v1388_v24 = vmul.f32 -1.442695, %v856_v63  ;;  %v648_v38 = vadd.f32 %v1886_v18, %v216_v15  ;;  %v655_v18 = vadd.f32 %v1898_v27, %v223_v60 }
 0x234   :  { %v749_v40 = vpop.permute.xlu0 %748  ;;  %v1427_v29 = vpop.eup %1426  ;;  %1436 = vpow2.f32 %v1381_v12  ;;  %v851_v34 = vadd.f32 %v718_v62, %v642_v35  ;;  %v974_v21 = vadd.f32 1.0, %v1425_v42 }
 0x235   :  { %1438 = vrcp.f32 %v971_v0  ;;  %v976_v23 = vadd.f32 1.0, %v1427_v29  ;;  %v858_v50 = vadd.f32 %v749_v40, %v649_v48  ;;  %v650_v29 = vadd.f32 %v1890_v22, %v218_v8 }
 0x236   :  { %v1429_v43 = vpop.eup %1428  ;;  %1440 = vrcp.f32 %v972_v7  ;;  %v1383_v54 = vmul.f32 -1.442695, %v851_v34 }
 0x237   :  { %v973_v32 = vadd.f32 1.0, %v1429_v43  ;;  %1442 = vpow2.f32 %v1386_v41  ;;  %v726_v44 = vpop.permute.xlu1 %725  ;;  %v1431_v17 = vpop.eup %1430  ;;  %v1390_v35 = vmul.f32 -1.442695, %v858_v50 }
 0x238   :  { %v757_v13 = vpop.permute.xlu0 %756  ;;  %1444 = vpow2.f32 %v1383_v54  ;;  %v853_v3 = vadd.f32 %v726_v44, %v644_v10  ;;  %v978_v59 = vadd.f32 1.0, %v1431_v17  ;;  %v220_v54 = vmul.f32 %v1900_v28, %v1752_v51 }
 0x239   :  { %1446 = vrcp.f32 %v973_v32  ;;  %v860_v61 = vadd.f32 %v757_v13, %v651_v36  ;;  %v222_v51 = vmul.f32 %v1900_v28, %v1761_v57 }
 0x23a   :  { %v1433_v16 = vpop.eup %1432  ;;  %1448 = vrcp.f32 %v974_v21  ;;  %v1385_v2 = vmul.f32 -1.442695, %v853_v3 }
 0x23b   :  { %1450 = vrcp.f32 %v976_v23  ;;  %v975_v37 = vadd.f32 1.0, %v1433_v16  ;;  %v734_v26 = vpop.permute.xlu1 %733  ;;  %v1435_v6 = vpop.eup %1434  ;;  %v1392_v42 = vmul.f32 -1.442695, %v860_v61  ;;  %v652_v23 = vadd.f32 %v1894_v25, %v220_v54 }
 0x23c   :  { %v765_v39 = vpop.permute.xlu0 %764  ;;  %1452 = vpow2.f32 %v1385_v2  ;;  %v855_v31 = vadd.f32 %v734_v26, %v646_v53  ;;  %v980_v52 = vadd.f32 1.0, %v1435_v6  ;;  %v2048_v6 = vld [vmem:[#allocation17_spill] sm:$0xff] }
 0x23d   :  { %1454 = vrcp.f32 %v975_v37  ;;  %v862_v11 = vadd.f32 %v765_v39, %v653_v9  ;;  %v224_v39 = vmul.f32 %v1900_v28, %v1774_v4 }
 0x23e   :  { %v1437_v5 = vpop.eup %1436  ;;  %1456 = vpow2.f32 %v1388_v24  ;;  %v1387_v20 = vmul.f32 -1.442695, %v855_v31  ;;  %v654_v24 = vadd.f32 %v1916_v45, %v222_v51 }
 0x23f   :  { %v1439_v7 = vpop.eup %1438  ;;  %1458 = vrcp.f32 %v978_v59  ;;  %v977_v12 = vadd.f32 1.0, %v1437_v5  ;;  %v742_v33 = vpop.permute.xlu1 %741  ;;  %v1394_v14 = vmul.f32 -1.442695, %v862_v11  ;;  %v656_v60 = vadd.f32 %v2048_v6, %v224_v39  ;;  %v2050_v11 = vld [vmem:[#allocation11_spill] sm:$0xff] }
 0x240   :  { %v773_v0 = vpop.permute.xlu0 %772  ;;  %v1441_v41 = vpop.eup %1440  ;;  %1460 = vpow2.f32 %v1387_v20  ;;  %v857_v55 = vadd.f32 %v742_v33, %v648_v38  ;;  %1073 = vperm.xlu1 %1415, %v1439_v7   ;;  %v2049_v7 = vld [vmem:[#allocation15_spill] sm:$0xff]  ;;  %v226_v33 = vmul.f32 %v1900_v28, %v2050_v11 }
 0x241   :  { %v1443_v62 = vpop.eup %1442  ;;  %1462 = vrcp.f32 %v977_v12  ;;  %v864_v43 = vadd.f32 %v773_v0, %v655_v18 }
 0x242   :  { %v1445_v40 = vpop.eup %1444  ;;  %1464 = vpow2.f32 %v1390_v35  ;;  %v1389_v34 = vmul.f32 -1.442695, %v857_v55  ;;  %v982_v32 = vadd.f32 1.0, %v1443_v62  ;;  %v658_v55 = vadd.f32 %v1928_v49, %v226_v33 }
 0x243   :  { %v1447_v10 = vpop.eup %1446  ;;  %v979_v58 = vadd.f32 1.0, %v1445_v40  ;;  %1466 = vpow2.f32 %v1392_v42  ;;  %v753_v21 = vpop.permute.xlu1 %752  ;;  %v1396_v48 = vmul.f32 -1.442695, %v864_v43  ;;  %v2052_v43 = vld [vmem:[#allocation12_spill] sm:$0xff] }
 0x244   :  { %v781_v47 = vpop.permute.xlu0 %780  ;;  %v1449_v63 = vpop.eup %1448  ;;  %1468 = vpow2.f32 %v1389_v34  ;;  %v859_v27 = vadd.f32 %v753_v21, %v650_v29  ;;  %1083 = vperm.xlu0 %1414, %v1447_v10   ;;  %1078 = vperm.xlu1 %1415, %v1441_v41   ;;  %v2051_v34 = vld [vmem:[#allocation16_spill] sm:$0xff]  ;;  %v228_v21 = vmul.f32 %v1900_v28, %v2052_v43 }
 0x245   :  { %v1451_v30 = vpop.eup %1450  ;;  %1470 = vrcp.f32 %v979_v58  ;;  %v866_v50 = vadd.f32 %v781_v47, %v1906_v46 }
 0x246   :  { %v1453_v22 = vpop.eup %1452  ;;  %1472 = vrcp.f32 %v980_v52  ;;  %v1391_v44 = vmul.f32 -1.442695, %v859_v27  ;;  %v660_v27 = vadd.f32 %v1930_v56, %v228_v21 }
 0x247   :  { %v1455_v13 = vpop.eup %1454  ;;  %v981_v17 = vadd.f32 1.0, %v1453_v22  ;;  %1474 = vpow2.f32 %v1394_v14  ;;  %v761_v3 = vpop.permute.xlu1 %760  ;;  %v1398_v46 = vmul.f32 -1.442695, %v866_v50 }
 0x248   :  { %v1457_v53 = vpop.eup %1456  ;;  %1476 = vpow2.f32 %v1391_v44  ;;  %v861_v36 = vadd.f32 %v761_v3, %v652_v23  ;;  %v789_v1 = vpop.permute.xlu0 %788  ;;  %1093 = vperm.xlu0 %1414, %v1455_v13   ;;  %1088 = vperm.xlu1 %1415, %v1449_v63  }
 0x249   :  { %v1459_v16 = vpop.eup %1458  ;;  %1478 = vrcp.f32 %v981_v17  ;;  %v984_v37 = vadd.f32 1.0, %v1457_v53  ;;  %v868_v12 = vadd.f32 %v789_v1, %v2049_v7 }
 0x24a   :  { %v1461_v25 = vpop.eup %1460  ;;  %1480 = vrcp.f32 %v982_v32  ;;  %v1393_v2 = vmul.f32 -1.442695, %v861_v36  ;;  %v2054_v36 = vld [vmem:[#allocation18_spill] sm:$0xff] }
 0x24b   :  { %v1463_v59 = vpop.eup %1462  ;;  %v983_v61 = vadd.f32 1.0, %v1461_v25  ;;  %1482 = vpow2.f32 %v1396_v48  ;;  %v769_v26 = vpop.permute.xlu1 %768  ;;  %v1400_v52 = vmul.f32 -1.442695, %v868_v12  ;;  %v2053_v48 = vld [vmem:[#allocation13_spill] sm:$0xff] }
 0x24c   :  { %v1465_v57 = vpop.eup %1464  ;;  %1484 = vpow2.f32 %v1393_v2  ;;  %v863_v15 = vadd.f32 %v769_v26, %v654_v24  ;;  %1103 = vperm.xlu0 %1414, %v1463_v59   ;;  %1098 = vperm.xlu1 %1415, %v1451_v30   ;;  %v797_v5 = vpop.permute.xlu0 %796  ;;  %v230_v3 = vmul.f32 %v1900_v28, %v2053_v48  ;;  %v1547_v48 = vld [vmem:[#allocation6 + $0x18] sm:$0xff] }
 0x24d   :  { %v1467_v31 = vpop.eup %1466  ;;  %1486 = vrcp.f32 %v983_v61  ;;  %v986_v35 = vadd.f32 1.0, %v1465_v57  ;;  %v870_v10 = vadd.f32 %v797_v5, %v2051_v34 }
 0x24e   :  { %v1469_v45 = vpop.eup %1468  ;;  %v1395_v9 = vmul.f32 -1.442695, %v863_v15  ;;  %1488 = vrcp.f32 %v984_v37  ;;  %v988_v62 = vadd.f32 1.0, %v1467_v31  ;;  %v662_v1 = vadd.f32 %v2054_v36, %v230_v3  ;;  %v2055_v37 = vld [vmem:[#allocation14_spill] sm:$0xff]  ;;  %v2056_v15 = vld [vmem:[#allocation19_spill] sm:$0xff] }
 0x24f   :  { %v1471_v38 = vpop.eup %1470  ;;  %v985_v20 = vadd.f32 1.0, %v1469_v45  ;;  %v777_v42 = vpop.permute.xlu1 %776  ;;  %v1402_v44 = vmul.f32 -1.442695, %v870_v10  ;;  %v232_v61 = vmul.f32 %v1900_v28, %v2055_v37  ;;  %v1552_v37 = vld [vmem:[#allocation6 + $0x40] sm:$0xff] }
 0x250   :  { %v1473_v4 = vpop.eup %1472  ;;  %1490 = vpow2.f32 %v1395_v9  ;;  %v865_v0 = vadd.f32 %v777_v42, %v656_v60  ;;  %1113 = vperm.xlu0 %1414, %v1471_v38   ;;  %1108 = vperm.xlu1 %1415, %v1459_v16   ;;  %v805_v47 = vpop.permute.xlu0 %804 }
 0x251   :  { %v1475_v41 = vpop.eup %1474  ;;  %1492 = vrcp.f32 %v985_v20  ;;  %v872_v13 = vadd.f32 %v805_v47, %v1926_v19  ;;  %v664_v31 = vadd.f32 %v2056_v15, %v232_v61 }
 0x252   :  { %v1477_v8 = vpop.eup %1476  ;;  %1494 = vpow2.f32 %v1398_v46  ;;  %v1397_v18 = vmul.f32 -1.442695, %v865_v0  ;;  %v990_v30 = vadd.f32 1.0, %v1475_v41 }
 0x253   :  { %v1479_v40 = vpop.eup %1478  ;;  %1496 = vrcp.f32 %v986_v35  ;;  %v987_v29 = vadd.f32 1.0, %v1477_v8  ;;  %v785_v58 = vpop.permute.xlu1 %784  ;;  %v1404_v19 = vmul.f32 -1.442695, %v872_v13  ;;  %v1546_v13 = vld [vmem:[#allocation6 + $0x10] sm:$0xff] }
 0x254   :  { %v1481_v14 = vpop.eup %1480  ;;  %1498 = vpow2.f32 %v1397_v18  ;;  %v867_v63 = vadd.f32 %v785_v58, %v658_v55  ;;  %1123 = vperm.xlu0 %1414, %v1479_v40   ;;  %1118 = vperm.xlu1 %1415, %v1473_v4  }
 0x255   :  { %v1483_v49 = vpop.eup %1482  ;;  %1500 = vrcp.f32 %v987_v29 }
 0x256   :  { %v1485_v54 = vpop.eup %1484  ;;  %1502 = vrcp.f32 %v988_v62  ;;  %v1399_v22 = vmul.f32 -1.442695, %v867_v63  ;;  %v992_v16 = vadd.f32 1.0, %v1483_v49 }
 0x257   :  { %v1487_v23 = vpop.eup %1486  ;;  %v989_v32 = vadd.f32 1.0, %v1485_v54  ;;  %1504 = vpow2.f32 %v1400_v52  ;;  %v793_v17 = vpop.permute.xlu1 %792 }
 0x258   :  { %1506 = vpow2.f32 %v1399_v22  ;;  %v869_v53 = vadd.f32 %v793_v17, %v660_v27  ;;  %1133 = vperm.xlu0 %1414, %v1487_v23   ;;  %1128 = vperm.xlu1 %1415, %v1481_v14   ;;  %v1489_v51 = vpop.eup %1488  ;;  %v1545_v23 = vld [vmem:[#allocation6 + $0x8] sm:$0xff] }
 0x259   :  { %1508 = vrcp.f32 %v989_v32 }
 0x25a   :  { %v1491_v56 = vpop.eup %1490  ;;  %1510 = vrcp.f32 %v990_v30  ;;  %v1401_v25 = vmul.f32 -1.442695, %v869_v53  ;;  %v1544_v30 = vld [vmem:[#allocation6] sm:$0xff] }
 0x25b   :  { %v1493_v24 = vpop.eup %1492  ;;  %v991_v50 = vadd.f32 1.0, %v1491_v56  ;;  %1512 = vpow2.f32 %v1402_v44  ;;  %v801_v2 = vpop.permute.xlu1 %800  ;;  %v1548_v56 = vld [vmem:[#allocation6 + $0x20] sm:$0xff] }
 0x25c   :  { %v1495_v59 = vpop.eup %1494  ;;  %1514 = vpow2.f32 %v1401_v25  ;;  %v871_v26 = vadd.f32 %v801_v2, %v662_v1  ;;  %1138 = vperm.xlu1 %1415, %v1489_v51   ;;  %1143 = vperm.xlu0 %1414, %v1493_v24   ;;  %v1549_v1 = vld [vmem:[#allocation6 + $0x28] sm:$0xff]  ;;  %v1550_v25 = vld [vmem:[#allocation6 + $0x30] sm:$0xff] }
 0x25d   :  { %v1497_v57 = vpop.eup %1496  ;;  %1516 = vrcp.f32 %v991_v50  ;;  %v994_v60 = vadd.f32 1.0, %v1495_v59  ;;  %v1551_v50 = vld [vmem:[#allocation6 + $0x38] sm:$0xff] }
 0x25e   :  { %v1499_v39 = vpop.eup %1498  ;;  %1518 = vrcp.f32 %v992_v16  ;;  %v1403_v45 = vmul.f32 -1.442695, %v871_v26  ;;  %v1553_v26 = vld [vmem:[#allocation6 + $0x48] sm:$0xff] }
 0x25f   :  { %v1501_v6 = vpop.eup %1500  ;;  %v993_v46 = vadd.f32 1.0, %v1499_v39  ;;  %1520 = vpow2.f32 %v1404_v19  ;;  %v809_v9 = vpop.permute.xlu1 %808  ;;  %v1554_v39 = vld [vmem:[#allocation6 + $0x50] sm:$0xff] }
 0x260   :  { %v1503_v5 = vpop.eup %1502  ;;  %1522 = vpow2.f32 %v1403_v45  ;;  %v873_v38 = vadd.f32 %v809_v9, %v664_v31  ;;  %1148 = vperm.xlu1 %1415, %v1497_v57   ;;  %1153 = vperm.xlu0 %1414, %v1501_v6   ;;  %v1555_v31 = vld [vmem:[#allocation6 + $0x58] sm:$0xff] }
 0x261   :  { %v1505_v28 = vpop.eup %1504  ;;  %1524 = vrcp.f32 %v993_v46  ;;  %v1556_v46 = vld [vmem:[#allocation6 + $0x60] sm:$0xff] }
 0x262   :  { %v1507_v35 = vpop.eup %1506  ;;  %v1405_v20 = vmul.f32 -1.442695, %v873_v38  ;;  %1526 = vrcp.f32 %v994_v60  ;;  %v996_v4 = vadd.f32 1.0, %v1505_v28  ;;  %v1558_v28 = vld [vmem:[#allocation6 + $0x70] sm:$0xff] }
 0x263   :  { %v1509_v7 = vpop.eup %1508  ;;  %v995_v12 = vadd.f32 1.0, %v1507_v35 }
 0x264   :  { %v1511_v42 = vpop.eup %1510  ;;  %1528 = vpow2.f32 %v1405_v20  ;;  %1158 = vperm.xlu1 %1415, %v1503_v5   ;;  %1163 = vperm.xlu0 %1414, %v1509_v7   ;;  %v1557_v5 = vld [vmem:[#allocation6 + $0x68] sm:$0xff]  ;;  %v1559_v20 = vld [vmem:[#allocation6 + $0x78] sm:$0xff] }
 0x265   :  { %v1513_v11 = vpop.eup %1512  ;;  %1530 = vrcp.f32 %v995_v12 }
 0x266   :  { %v1515_v33 = vpop.eup %1514  ;;  %1532 = vrcp.f32 %v996_v4  ;;  %v998_v55 = vadd.f32 1.0, %v1513_v11  ;;  %v1560_v4 = vld [vmem:[#allocation6 + $0x80] sm:$0xff] }
 0x267   :  { %v1517_v0 = vpop.eup %1516  ;;  %v997_v41 = vadd.f32 1.0, %v1515_v33  ;;  %v1561_v33 = vld [vmem:[#allocation6 + $0x88] sm:$0xff] }
 0x268   :  { %v1519_v8 = vpop.eup %1518  ;;  %1168 = vperm.xlu1 %1415, %v1511_v42   ;;  %1173 = vperm.xlu0 %1414, %v1517_v0  }
 0x269   :  { %v1521_v62 = vpop.eup %1520  ;;  %1534 = vrcp.f32 %v997_v41  ;;  %v1562_v41 = vld [vmem:[#allocation6 + $0x90] sm:$0xff] }
 0x26a   :  { %v1523_v18 = vpop.eup %1522  ;;  %1536 = vrcp.f32 %v998_v55  ;;  %v1000_v52 = vadd.f32 1.0, %v1521_v62  ;;  %v1563_v55 = vld [vmem:[#allocation6 + $0x98] sm:$0xff] }
 0x26b   :  { %v1525_v40 = vpop.eup %1524  ;;  %v999_v29 = vadd.f32 1.0, %v1523_v18 }
 0x26c   :  { %1178 = vperm.xlu1 %1415, %v1519_v8   ;;  %1183 = vperm.xlu0 %1414, %v1525_v40   ;;  %v1527_v34 = vpop.eup %1526 }
 0x26d   :  { %1538 = vrcp.f32 %v999_v29  ;;  %v1564_v29 = vld [vmem:[#allocation6 + $0xa0] sm:$0xff] }
 0x26e   :  { %v1529_v10 = vpop.eup %1528  ;;  %1540 = vrcp.f32 %v1000_v52 }
 0x26f   :  { %v1531_v58 = vpop.eup %1530  ;;  %v1001_v14 = vadd.f32 1.0, %v1529_v10 }
 0x270   :  { %1188 = vperm.xlu1 %1415, %v1527_v34   ;;  %1193 = vperm.xlu0 %1414, %v1531_v58   ;;  %v1533_v43 = vpop.eup %1532  ;;  %v1565_v34 = vld [vmem:[#allocation6 + $0xa8] sm:$0xff]  ;;  %v1566_v58 = vld [vmem:[#allocation6 + $0xb0] sm:$0xff] }
 0x271   :  { %1542 = vrcp.f32 %v1001_v14 }
 0x273   :  { %v1535_v21 = vpop.eup %1534 }
 0x274   :  { %1198 = vperm.xlu1 %1415, %v1533_v43   ;;  %1203 = vperm.xlu0 %1414, %v1535_v21   ;;  %v1537_v47 = vpop.eup %1536  ;;  %v1567_v43 = vld [vmem:[#allocation6 + $0xb8] sm:$0xff] }
 0x277   :  { %v1539_v63 = vpop.eup %1538 }
 0x278   :  { %1208 = vperm.xlu1 %1415, %v1537_v47   ;;  %1213 = vperm.xlu0 %1414, %v1539_v63   ;;  %v1541_v49 = vpop.eup %1540 }
 0x27b   :  { %v1543_v54 = vpop.eup %1542 }
 0x27c   :  { %1218 = vperm.xlu1 %1415, %v1541_v49   ;;  %1223 = vperm.xlu0 %1414, %v1543_v54   ;;  %v1568_v49 = vld [vmem:[#allocation6 + $0xc0] sm:$0xff] }
 0x2af   :  { %v1069_v27 = vpop.permute.xlu0 %1068 }
 0x2b0   :  { %v1226_v22 = vmul.f32 %v1544_v30, %v1069_v27  ;;  %v1227_v32 = vmul.f32 %v1545_v23, %v1069_v27  ;;  %v1569_v27 = vld [vmem:[#allocation6 + $0xc8] sm:$0xff] }
 0x2b2   :  { %1290 = vst [vmem:[#allocation7] sm:$0xff] %v1226_v22  ;;  %1291 = vst [vmem:[#allocation7 + $0x8] sm:$0xff] %v1227_v32  ;;  %v1570_v22 = vld [vmem:[#allocation6 + $0xd0] sm:$0xff]  ;;  %v1571_v32 = vld [vmem:[#allocation6 + $0xd8] sm:$0xff] }
 0x2bf   :  { %v1074_v44 = vpop.permute.xlu1 %1073 }
 0x2c0   :  { %v1228_v17 = vmul.f32 %v1546_v13, %v1074_v44  ;;  %v1229_v3 = vmul.f32 %v1547_v48, %v1074_v44  ;;  %v1572_v48 = vld [vmem:[#allocation6 + $0xe0] sm:$0xff] }
 0x2c2   :  { %1292 = vst [vmem:[#allocation7 + $0x10] sm:$0xff] %v1228_v17  ;;  %1293 = vst [vmem:[#allocation7 + $0x18] sm:$0xff] %v1229_v3 }
 0x2c3   :  { %v1079_v53 = vpop.permute.xlu1 %1078  ;;  %v1084_v51 = vpop.permute.xlu0 %1083 }
 0x2c4   :  { %v1230_v36 = vmul.f32 %v1548_v56, %v1079_v53  ;;  %v1231_v16 = vmul.f32 %v1549_v1, %v1079_v53  ;;  %v1232_v24 = vmul.f32 %v1550_v25, %v1084_v51  ;;  %v1233_v19 = vmul.f32 %v1551_v50, %v1084_v51  ;;  %v1573_v53 = vld [vmem:[#allocation6 + $0xe8] sm:$0xff]  ;;  %v1574_v56 = vld [vmem:[#allocation6 + $0xf0] sm:$0xff]  ;;  %v1575_v1 = vld [vmem:[#allocation6 + $0xf8] sm:$0xff] }
 0x2c5   :  { %v1576_v50 = vld [vmem:[#allocation6 + $0x100] sm:$0xff] }
 0x2c6   :  { %1294 = vst [vmem:[#allocation7 + $0x20] sm:$0xff] %v1230_v36  ;;  %1295 = vst [vmem:[#allocation7 + $0x28] sm:$0xff] %v1231_v16 }
 0x2c7   :  { %1296 = vst [vmem:[#allocation7 + $0x30] sm:$0xff] %v1232_v24  ;;  %1297 = vst [vmem:[#allocation7 + $0x38] sm:$0xff] %v1233_v19  ;;  %v1089_v2 = vpop.permute.xlu1 %1088  ;;  %v1094_v59 = vpop.permute.xlu0 %1093 }
 0x2c8   :  { %v1234_v61 = vmul.f32 %v1552_v37, %v1089_v2  ;;  %v1235_v57 = vmul.f32 %v1553_v26, %v1089_v2  ;;  %v1236_v15 = vmul.f32 %v1554_v39, %v1094_v59  ;;  %v1237_v45 = vmul.f32 %v1555_v31, %v1094_v59  ;;  %v1577_v2 = vld [vmem:[#allocation6 + $0x108] sm:$0xff]  ;;  %v1578_v37 = vld [vmem:[#allocation6 + $0x110] sm:$0xff]  ;;  %v1579_v26 = vld [vmem:[#allocation6 + $0x118] sm:$0xff] }
 0x2c9   :  { %v1580_v31 = vld [vmem:[#allocation6 + $0x120] sm:$0xff] }
 0x2ca   :  { %1298 = vst [vmem:[#allocation7 + $0x40] sm:$0xff] %v1234_v61  ;;  %1299 = vst [vmem:[#allocation7 + $0x48] sm:$0xff] %v1235_v57 }
 0x2cb   :  { %1300 = vst [vmem:[#allocation7 + $0x50] sm:$0xff] %v1236_v15  ;;  %1301 = vst [vmem:[#allocation7 + $0x58] sm:$0xff] %v1237_v45  ;;  %v1099_v6 = vpop.permute.xlu1 %1098  ;;  %v1104_v60 = vpop.permute.xlu0 %1103 }
 0x2cc   :  { %v1238_v9 = vmul.f32 %v1556_v46, %v1099_v6  ;;  %v1239_v38 = vmul.f32 %v1557_v5, %v1099_v6  ;;  %v1240_v35 = vmul.f32 %v1558_v28, %v1104_v60  ;;  %v1241_v7 = vmul.f32 %v1559_v20, %v1104_v60  ;;  %v1581_v6 = vld [vmem:[#allocation6 + $0x128] sm:$0xff]  ;;  %v1582_v46 = vld [vmem:[#allocation6 + $0x130] sm:$0xff]  ;;  %v1583_v5 = vld [vmem:[#allocation6 + $0x138] sm:$0xff] }
 0x2cd   :  { %v1584_v20 = vld [vmem:[#allocation6 + $0x140] sm:$0xff] }
 0x2ce   :  { %1302 = vst [vmem:[#allocation7 + $0x60] sm:$0xff] %v1238_v9  ;;  %1303 = vst [vmem:[#allocation7 + $0x68] sm:$0xff] %v1239_v38 }
 0x2cf   :  { %1304 = vst [vmem:[#allocation7 + $0x70] sm:$0xff] %v1240_v35  ;;  %1305 = vst [vmem:[#allocation7 + $0x78] sm:$0xff] %v1241_v7  ;;  %v1109_v12 = vpop.permute.xlu1 %1108  ;;  %v1114_v42 = vpop.permute.xlu0 %1113 }
 0x2d0   :  { %v1242_v11 = vmul.f32 %v1560_v4, %v1109_v12  ;;  %v1243_v0 = vmul.f32 %v1561_v33, %v1109_v12  ;;  %v1244_v8 = vmul.f32 %v1562_v41, %v1114_v42  ;;  %v1245_v62 = vmul.f32 %v1563_v55, %v1114_v42  ;;  %v1585_v12 = vld [vmem:[#allocation6 + $0x148] sm:$0xff]  ;;  %v1586_v4 = vld [vmem:[#allocation6 + $0x150] sm:$0xff]  ;;  %v1587_v33 = vld [vmem:[#allocation6 + $0x158] sm:$0xff] }
 0x2d1   :  { %v1588_v55 = vld [vmem:[#allocation6 + $0x160] sm:$0xff] }
 0x2d2   :  { %1306 = vst [vmem:[#allocation7 + $0x80] sm:$0xff] %v1242_v11  ;;  %1307 = vst [vmem:[#allocation7 + $0x88] sm:$0xff] %v1243_v0 }
 0x2d3   :  { %1308 = vst [vmem:[#allocation7 + $0x90] sm:$0xff] %v1244_v8  ;;  %1309 = vst [vmem:[#allocation7 + $0x98] sm:$0xff] %v1245_v62  ;;  %v1119_v18 = vpop.permute.xlu1 %1118  ;;  %v1124_v40 = vpop.permute.xlu0 %1123 }
 0x2d4   :  { %v1246_v52 = vmul.f32 %v1564_v29, %v1119_v18  ;;  %v1247_v10 = vmul.f32 %v1565_v34, %v1119_v18  ;;  %v1248_v14 = vmul.f32 %v1566_v58, %v1124_v40  ;;  %v1249_v21 = vmul.f32 %v1567_v43, %v1124_v40  ;;  %v1589_v18 = vld [vmem:[#allocation6 + $0x168] sm:$0xff]  ;;  %v1590_v29 = vld [vmem:[#allocation6 + $0x170] sm:$0xff]  ;;  %v1591_v34 = vld [vmem:[#allocation6 + $0x178] sm:$0xff] }
 0x2d5   :  { %v1592_v43 = vld [vmem:[#allocation6 + $0x180] sm:$0xff] }
 0x2d6   :  { %1310 = vst [vmem:[#allocation7 + $0xa0] sm:$0xff] %v1246_v52  ;;  %1311 = vst [vmem:[#allocation7 + $0xa8] sm:$0xff] %v1247_v10 }
 0x2d7   :  { %1312 = vst [vmem:[#allocation7 + $0xb0] sm:$0xff] %v1248_v14  ;;  %1313 = vst [vmem:[#allocation7 + $0xb8] sm:$0xff] %v1249_v21  ;;  %v1129_v47 = vpop.permute.xlu1 %1128  ;;  %v1134_v63 = vpop.permute.xlu0 %1133 }
 0x2d8   :  { %v1250_v54 = vmul.f32 %v1568_v49, %v1129_v47  ;;  %v1251_v30 = vmul.f32 %v1569_v27, %v1129_v47  ;;  %v1252_v23 = vmul.f32 %v1570_v22, %v1134_v63  ;;  %v1253_v44 = vmul.f32 %v1571_v32, %v1134_v63  ;;  %v1593_v47 = vld [vmem:[#allocation6 + $0x188] sm:$0xff]  ;;  %v1594_v49 = vld [vmem:[#allocation6 + $0x190] sm:$0xff]  ;;  %v1595_v27 = vld [vmem:[#allocation6 + $0x198] sm:$0xff] }
 0x2d9   :  { %v1596_v32 = vld [vmem:[#allocation6 + $0x1a0] sm:$0xff] }
 0x2da   :  { %1314 = vst [vmem:[#allocation7 + $0xc0] sm:$0xff] %v1250_v54  ;;  %1315 = vst [vmem:[#allocation7 + $0xc8] sm:$0xff] %v1251_v30 }
 0x2db   :  { %1316 = vst [vmem:[#allocation7 + $0xd0] sm:$0xff] %v1252_v23  ;;  %1317 = vst [vmem:[#allocation7 + $0xd8] sm:$0xff] %v1253_v44  ;;  %v1139_v13 = vpop.permute.xlu1 %1138  ;;  %v1144_v17 = vpop.permute.xlu0 %1143 }
 0x2dc   :  { %v1254_v3 = vmul.f32 %v1572_v48, %v1139_v13  ;;  %v1255_v51 = vmul.f32 %v1573_v53, %v1139_v13  ;;  %v1256_v36 = vmul.f32 %v1574_v56, %v1144_v17  ;;  %v1257_v16 = vmul.f32 %v1575_v1, %v1144_v17  ;;  %v1597_v13 = vld [vmem:[#allocation6 + $0x1a8] sm:$0xff]  ;;  %v1598_v48 = vld [vmem:[#allocation6 + $0x1b0] sm:$0xff]  ;;  %v1599_v53 = vld [vmem:[#allocation6 + $0x1b8] sm:$0xff] }
 0x2dd   :  { %v1600_v1 = vld [vmem:[#allocation6 + $0x1c0] sm:$0xff] }
 0x2de   :  { %1318 = vst [vmem:[#allocation7 + $0xe0] sm:$0xff] %v1254_v3  ;;  %1319 = vst [vmem:[#allocation7 + $0xe8] sm:$0xff] %v1255_v51 }
 0x2df   :  { %1320 = vst [vmem:[#allocation7 + $0xf0] sm:$0xff] %v1256_v36  ;;  %1321 = vst [vmem:[#allocation7 + $0xf8] sm:$0xff] %v1257_v16  ;;  %v1149_v25 = vpop.permute.xlu1 %1148  ;;  %v1154_v24 = vpop.permute.xlu0 %1153 }
 0x2e0   :  { %v1258_v19 = vmul.f32 %v1576_v50, %v1149_v25  ;;  %v1259_v59 = vmul.f32 %v1577_v2, %v1149_v25  ;;  %v1260_v61 = vmul.f32 %v1578_v37, %v1154_v24  ;;  %v1261_v57 = vmul.f32 %v1579_v26, %v1154_v24  ;;  %v1601_v25 = vld [vmem:[#allocation6 + $0x1c8] sm:$0xff]  ;;  %v1602_v50 = vld [vmem:[#allocation6 + $0x1d0] sm:$0xff]  ;;  %v1603_v2 = vld [vmem:[#allocation6 + $0x1d8] sm:$0xff] }
 0x2e1   :  { %v1604_v26 = vld [vmem:[#allocation6 + $0x1e0] sm:$0xff] }
 0x2e2   :  { %1322 = vst [vmem:[#allocation7 + $0x100] sm:$0xff] %v1258_v19  ;;  %1323 = vst [vmem:[#allocation7 + $0x108] sm:$0xff] %v1259_v59 }
 0x2e3   :  { %1324 = vst [vmem:[#allocation7 + $0x110] sm:$0xff] %v1260_v61  ;;  %1325 = vst [vmem:[#allocation7 + $0x118] sm:$0xff] %v1261_v57  ;;  %v1159_v39 = vpop.permute.xlu1 %1158  ;;  %v1164_v15 = vpop.permute.xlu0 %1163 }
 0x2e4   :  { %v1262_v45 = vmul.f32 %v1580_v31, %v1159_v39  ;;  %v1263_v60 = vmul.f32 %v1581_v6, %v1159_v39  ;;  %v1264_v9 = vmul.f32 %v1582_v46, %v1164_v15  ;;  %v1265_v38 = vmul.f32 %v1583_v5, %v1164_v15  ;;  %v1605_v39 = vld [vmem:[#allocation6 + $0x1e8] sm:$0xff]  ;;  %v1606_v31 = vld [vmem:[#allocation6 + $0x1f0] sm:$0xff]  ;;  %v1607_v6 = vld [vmem:[#allocation6 + $0x1f8] sm:$0xff] }
 0x2e6   :  { %1326 = vst [vmem:[#allocation7 + $0x120] sm:$0xff] %v1262_v45  ;;  %1327 = vst [vmem:[#allocation7 + $0x128] sm:$0xff] %v1263_v60 }
 0x2e7   :  { %1328 = vst [vmem:[#allocation7 + $0x130] sm:$0xff] %v1264_v9  ;;  %1329 = vst [vmem:[#allocation7 + $0x138] sm:$0xff] %v1265_v38  ;;  %v1169_v28 = vpop.permute.xlu1 %1168  ;;  %v1174_v35 = vpop.permute.xlu0 %1173 }
 0x2e8   :  { %v1266_v7 = vmul.f32 %v1584_v20, %v1169_v28  ;;  %v1267_v42 = vmul.f32 %v1585_v12, %v1169_v28  ;;  %v1268_v11 = vmul.f32 %v1586_v4, %v1174_v35  ;;  %v1269_v0 = vmul.f32 %v1587_v33, %v1174_v35 }
 0x2ea   :  { %1330 = vst [vmem:[#allocation7 + $0x140] sm:$0xff] %v1266_v7  ;;  %1331 = vst [vmem:[#allocation7 + $0x148] sm:$0xff] %v1267_v42 }
 0x2eb   :  { %1332 = vst [vmem:[#allocation7 + $0x150] sm:$0xff] %v1268_v11  ;;  %1333 = vst [vmem:[#allocation7 + $0x158] sm:$0xff] %v1269_v0  ;;  %v1179_v41 = vpop.permute.xlu1 %1178  ;;  %v1184_v8 = vpop.permute.xlu0 %1183 }
 0x2ec   :  { %v1270_v62 = vmul.f32 %v1588_v55, %v1179_v41  ;;  %v1271_v40 = vmul.f32 %v1589_v18, %v1179_v41  ;;  %v1272_v52 = vmul.f32 %v1590_v29, %v1184_v8  ;;  %v1273_v10 = vmul.f32 %v1591_v34, %v1184_v8 }
 0x2ee   :  { %1334 = vst [vmem:[#allocation7 + $0x160] sm:$0xff] %v1270_v62  ;;  %1335 = vst [vmem:[#allocation7 + $0x168] sm:$0xff] %v1271_v40 }
 0x2ef   :  { %1336 = vst [vmem:[#allocation7 + $0x170] sm:$0xff] %v1272_v52  ;;  %1337 = vst [vmem:[#allocation7 + $0x178] sm:$0xff] %v1273_v10  ;;  %v1189_v58 = vpop.permute.xlu1 %1188  ;;  %v1194_v14 = vpop.permute.xlu0 %1193 }
 0x2f0   :  { %v1274_v21 = vmul.f32 %v1592_v43, %v1189_v58  ;;  %v1275_v63 = vmul.f32 %v1593_v47, %v1189_v58  ;;  %v1276_v54 = vmul.f32 %v1594_v49, %v1194_v14  ;;  %v1277_v30 = vmul.f32 %v1595_v27, %v1194_v14 }
 0x2f2   :  { %1338 = vst [vmem:[#allocation7 + $0x180] sm:$0xff] %v1274_v21  ;;  %1339 = vst [vmem:[#allocation7 + $0x188] sm:$0xff] %v1275_v63 }
 0x2f3   :  { %1340 = vst [vmem:[#allocation7 + $0x190] sm:$0xff] %v1276_v54  ;;  %1341 = vst [vmem:[#allocation7 + $0x198] sm:$0xff] %v1277_v30  ;;  %v1199_v22 = vpop.permute.xlu1 %1198  ;;  %v1204_v23 = vpop.permute.xlu0 %1203 }
 0x2f4   :  { %v1278_v44 = vmul.f32 %v1596_v32, %v1199_v22  ;;  %v1279_v17 = vmul.f32 %v1597_v13, %v1199_v22  ;;  %v1280_v3 = vmul.f32 %v1598_v48, %v1204_v23  ;;  %v1281_v51 = vmul.f32 %v1599_v53, %v1204_v23 }
 0x2f6   :  { %1342 = vst [vmem:[#allocation7 + $0x1a0] sm:$0xff] %v1278_v44  ;;  %1343 = vst [vmem:[#allocation7 + $0x1a8] sm:$0xff] %v1279_v17 }
 0x2f7   :  { %1344 = vst [vmem:[#allocation7 + $0x1b0] sm:$0xff] %v1280_v3  ;;  %1345 = vst [vmem:[#allocation7 + $0x1b8] sm:$0xff] %v1281_v51  ;;  %v1209_v56 = vpop.permute.xlu1 %1208  ;;  %v1214_v36 = vpop.permute.xlu0 %1213 }
 0x2f8   :  { %v1282_v16 = vmul.f32 %v1600_v1, %v1209_v56  ;;  %v1283_v24 = vmul.f32 %v1601_v25, %v1209_v56  ;;  %v1284_v19 = vmul.f32 %v1602_v50, %v1214_v36  ;;  %v1285_v59 = vmul.f32 %v1603_v2, %v1214_v36 }
 0x2fa   :  { %1346 = vst [vmem:[#allocation7 + $0x1c0] sm:$0xff] %v1282_v16  ;;  %1347 = vst [vmem:[#allocation7 + $0x1c8] sm:$0xff] %v1283_v24 }
 0x2fb   :  { %1348 = vst [vmem:[#allocation7 + $0x1d0] sm:$0xff] %v1284_v19  ;;  %1349 = vst [vmem:[#allocation7 + $0x1d8] sm:$0xff] %v1285_v59  ;;  %v1219_v37 = vpop.permute.xlu1 %1218  ;;  %v1224_v61 = vpop.permute.xlu0 %1223 }
 0x2fc   :  { %v1286_v57 = vmul.f32 %v1604_v26, %v1219_v37  ;;  %v1287_v15 = vmul.f32 %v1605_v39, %v1219_v37  ;;  %v1288_v45 = vmul.f32 %v1606_v31, %v1224_v61  ;;  %v1289_v60 = vmul.f32 %v1607_v6, %v1224_v61 }
 0x2fe   :  { %1350 = vst [vmem:[#allocation7 + $0x1e0] sm:$0xff] %v1286_v57  ;;  %1351 = vst [vmem:[#allocation7 + $0x1e8] sm:$0xff] %v1287_v15 }
 0x2ff   :  { %1352 = vst [vmem:[#allocation7 + $0x1f0] sm:$0xff] %v1288_v45  ;;  %1353 = vst [vmem:[#allocation7 + $0x1f8] sm:$0xff] %v1289_v60 }
 0x300   :  { %1651 = shalt.err (!%p1648_p1)
}
 0x301   :  { %s1652_s13 = scalar_lea.hbm %s2034_s2, 8192 }
 0x302   :  { %p1653_p2 = scmp.ne.s32.totalorder %s2034_s2, %s1652_s13  ;;  %p1656_p3 = scmp.lt.u32.totalorder %s1652_s13, %s2034_s2 }
 0x304   :  { %p1658_p4 = pnand %p1656_p3, %p1653_p2 }
 0x306   :  { %1661 = shalt.err (!%p1658_p4)
}
 0x307   :  { %1365 = dma.vmem_to_hbm [thread:$0]  %s1360_s9, 8192, %s2034_s2, [#allocation4], %s1670_s0, %s1670_s0, %s1671_s29  }
 0x308   :  { %1666 = dma.done.wait [#allocation4], 8192  }
 0x309   :  { %1667 = vsyncadd [#allocation4], 4294959104 }
 0x30a   :  { %1369 = vsyncpa [#allocation3], 1 }
 0x30b   :  { %1370 = vsyncpa [#allocation4], 1 }
 0x30c   :  { %1371 = vsyncpa [#allocation5], 1 }

</bundles_post_ra>
